<compile_context>
chip_gen: v7x
topology: tpu7x:2x2x1
jax: 0.10.0
libtpu: 0.0.40
codegen_flags: <defaults>
</compile_context>

<pallas_src>
import jax
import jax.numpy as jnp
import numpy as np
from jax.experimental import pallas as pl
from jax.experimental.pallas import tpu as pltpu

EPS = 1e-5
F32 = jnp.float32


# ------------------------------ kernels ------------------------------------ #

def _stats_kernel(x_ref, ps_ref):
    """Per-tile partial per-channel sum / sum-of-squares of x."""
    x = x_ref[0].astype(F32)                          # (C, tT)
    s = jnp.sum(x, axis=1, keepdims=True)             # (C, 1)
    sq = jnp.sum(x * x, axis=1, keepdims=True)        # (C, 1)
    ps_ref[0, 0] = jnp.concatenate([s, sq], axis=1)   # (C, 2)


def _stage0_kernel(x_ref, sc_ref, sh_ref, w0_ref, b0_ref, net_ref, ps_ref):
    """net = fc_0(relu(bn_0(x, c))) on one (batch, T-tile) block, plus partial
    per-channel sum / sum-of-squares of net for the second batch norm."""
    x = x_ref[0].astype(F32)                          # (Cin, tT)
    scale = sc_ref[0].astype(F32)                     # (Cin, 1)  folded CBN
    shift = sh_ref[0].astype(F32)                     # (Cin, 1)
    h = jnp.maximum(scale * x + shift, 0.0)           # CBN + ReLU (VPU)
    net = jnp.dot(w0_ref[...].astype(F32), h,         # (H, tT)   (MXU)
                  preferred_element_type=F32) + b0_ref[...].astype(F32)
    net_ref[0] = net.astype(net_ref.dtype)            # lane-dense store
    s = jnp.sum(net, axis=1, keepdims=True)           # (H, 1)
    sq = jnp.sum(net * net, axis=1, keepdims=True)    # (H, 1)
    ps_ref[0, 0] = jnp.concatenate([s, sq], axis=1)   # (H, 2)


def _stage1_kernel(net_ref, x_ref, sc_ref, sh_ref, w_ref, b1_ref, o_ref):
    """out = [relu(bn_1(net, c)); x] @ [w1 ; w_shortcut]^T + b1.
    fc_1 and the shortcut are fused into a single stacked-weight matmul."""
    net = net_ref[0].astype(F32)                      # (H, tT)
    x = x_ref[0].astype(F32)                          # (Cin, tT)
    scale = sc_ref[0].astype(F32)                     # (H, 1)
    shift = sh_ref[0].astype(F32)                     # (H, 1)
    h = jnp.maximum(scale * net + shift, 0.0)         # CBN + ReLU
    cat = jnp.concatenate([h, x], axis=0)             # (H + Cin, tT)
    out = jnp.dot(w_ref[...].astype(F32), cat,        # (Cout, tT)
                  preferred_element_type=F32) + b1_ref[...].astype(F32)
    o_ref[0] = out.astype(o_ref.dtype)                # lane-dense store


# ------------------------------ wrapper ------------------------------------ #

def _pick_tile(T):
    # Biggest lane tile that divides T; fall back to a single full-extent tile.
    # TODO(synk): for huge T not divisible by 128, add lane masking for the
    # ragged tail instead of the single full-extent fallback.
    for cand in (512, 256, 128):
        if T % cand == 0:
            return cand
    return T


def _fold_bn(gamma, beta, stats, n):
    """Fold batch statistics + conditional gamma/beta into scale/shift so the
    in-kernel BN apply is a single fused multiply-add per element."""
    mean = stats[:, 0] / n                                    # (C,)
    var = jnp.maximum(stats[:, 1] / n - mean * mean, 0.0)     # biased variance
    inv = jax.lax.rsqrt(var + EPS)
    scale = gamma * inv[None, :]                              # (B, C)
    shift = beta - scale * mean[None, :]                      # (B, C)
    return scale[:, :, None], shift[:, :, None]               # (B, C, 1)


def cresnet_block(x, c, params):
    """x: (B, Cin, T) PyTorch NCL.  c: (B, c_dim).  Returns (B, Cout, T)."""
    B, Cin, T = x.shape
    H = params['w0'].shape[0]
    Cout = params['w1'].shape[0]
    dtype = x.dtype
    tT = _pick_tile(T)
    nT = T // tT
    n = B * T
    dimsem = pltpu.CompilerParams(
        dimension_semantics=("parallel", "parallel"))

    # Conditional gamma/beta: 1x1 conv on c (length 1) == tiny matmul + bias.
    cf = c.astype(F32)
    gamma0 = cf @ params['wg0'].astype(F32) + params['bg0'].astype(F32)
    beta0 = cf @ params['wb0'].astype(F32) + params['bb0'].astype(F32)
    gamma1 = cf @ params['wg1'].astype(F32) + params['bg1'].astype(F32)
    beta1 = cf @ params['wb1'].astype(F32) + params['bb1'].astype(F32)

    # ---- pass 1: per-channel batch statistics of x (tiled, parallel) ----
    stats_x = pl.pallas_call(
        _stats_kernel,
        grid=(B, nT),
        in_specs=[pl.BlockSpec((1, Cin, tT), lambda b, i: (b, 0, i))],
        out_specs=pl.BlockSpec((1, 1, Cin, 2), lambda b, i: (b, i, 0, 0)),
        out_shape=jax.ShapeDtypeStruct((B, nT, Cin, 2), F32),
        compiler_params=dimsem,
    )(x)
    scale0, shift0 = _fold_bn(gamma0, beta0, stats_x.sum(axis=(0, 1)), n)

    # ---- pass 2: net = fc_0(relu(bn_0(x, c))) + partial stats of net ----
    w0 = params['w0']                       # (H, Cin)
    b0 = params['b0'].reshape(H, 1)
    net, stats_n = pl.pallas_call(
        _stage0_kernel,
        grid=(B, nT),
        in_specs=[
            pl.BlockSpec((1, Cin, tT), lambda b, i: (b, 0, i)),    # x
            pl.BlockSpec((1, Cin, 1), lambda b, i: (b, 0, 0)),     # scale0
            pl.BlockSpec((1, Cin, 1), lambda b, i: (b, 0, 0)),     # shift0
            pl.BlockSpec((H, Cin), lambda b, i: (0, 0)),           # w0
            pl.BlockSpec((H, 1), lambda b, i: (0, 0)),             # b0
        ],
        out_specs=(
            pl.BlockSpec((1, H, tT), lambda b, i: (b, 0, i)),      # net
            pl.BlockSpec((1, 1, H, 2), lambda b, i: (b, i, 0, 0)), # partial stats
        ),
        out_shape=(
            jax.ShapeDtypeStruct((B, H, T), dtype),
            jax.ShapeDtypeStruct((B, nT, H, 2), F32),
        ),
        compiler_params=dimsem,
    )(x, scale0, shift0, w0, b0)
    scale1, shift1 = _fold_bn(gamma1, beta1, stats_n.sum(axis=(0, 1)), n)

    # ---- pass 3: out = [relu(bn_1(net, c)); x] @ [w1 ; ws]^T + b1 ----
    ws = params.get('ws', None)
    if ws is None:                          # identity shortcut (Cin == Cout)
        ws = jnp.eye(Cin, dtype=params['w1'].dtype)
    w1s = jnp.concatenate([params['w1'], ws], axis=1)   # (Cout, H + Cin)
    b1 = params['b1'].reshape(Cout, 1)
    out = pl.pallas_call(
        _stage1_kernel,
        grid=(B, nT),
        in_specs=[
            pl.BlockSpec((1, H, tT), lambda b, i: (b, 0, i)),      # net
            pl.BlockSpec((1, Cin, tT), lambda b, i: (b, 0, i)),    # x
            pl.BlockSpec((1, H, 1), lambda b, i: (b, 0, 0)),       # scale1
            pl.BlockSpec((1, H, 1), lambda b, i: (b, 0, 0)),       # shift1
            pl.BlockSpec((Cout, H + Cin), lambda b, i: (0, 0)),    # [w1 ; ws]
            pl.BlockSpec((Cout, 1), lambda b, i: (0, 0)),          # b1
        ],
        out_specs=pl.BlockSpec((1, Cout, tT), lambda b, i: (b, 0, i)),
        out_shape=jax.ShapeDtypeStruct((B, Cout, T), dtype),
        compiler_params=dimsem,
    )(net, x, scale1, shift1, w1s, b1)
    return out


# ----------------------------- reference ----------------------------------- #

def reference(x, c, p):
    """Pure-JAX reference mirroring the PyTorch forward (training-mode BN)."""
    x = x.astype(F32)
    c = c.astype(F32)
    HI = jax.lax.Precision.HIGHEST

    def cbn(h, wg, bg, wb, bb):
        gamma = c @ wg + bg                                       # (B, C)
        beta = c @ wb + bb
        mean = jnp.mean(h, axis=(0, 2), keepdims=True)
        var = jnp.mean((h - mean) ** 2, axis=(0, 2), keepdims=True)  # biased
        hn = (h - mean) / jnp.sqrt(var + EPS)
        return gamma[:, :, None] * hn + beta[:, :, None]

    net = jnp.maximum(cbn(x, p['wg0'], p['bg0'], p['wb0'], p['bb0']), 0.0)
    net = jnp.einsum('hc,bct->bht', p['w0'], net, precision=HI) \
        + p['b0'][None, :, None]
    h = jnp.maximum(cbn(net, p['wg1'], p['bg1'], p['wb1'], p['bb1']), 0.0)
    dx = jnp.einsum('oh,bht->bot', p['w1'], h, precision=HI) \
        + p['b1'][None, :, None]
    ws = p.get('ws', None)
    x_s = x if ws is None else jnp.einsum('oc,bct->bot', ws, x, precision=HI)
    return x_s + dx


# -------------------------------- test -------------------------------------- #

if __name__ == "__main__":
    # Small config: c_dim=8, size_in=16, size_h=32, size_out=24 (=> shortcut conv)
    B, T = 2, 1024
    c_dim, size_in, size_h, size_out = 8, 16, 32, 24

    key = jax.random.PRNGKey(0)
    ks = jax.random.split(key, 16)

    # Conv1d(kernel=1) weights stored as (out, in) matrices (PyTorch orientation
    # with the trailing kernel dim squeezed); gamma/beta weights stored
    # matmul-ready as (c_dim, f_dim).  Values are random (not the PyTorch
    # zeros/ones init) so the full compute path is exercised.
    params = {
        'wg0': jax.random.normal(ks[0], (c_dim, size_in), F32) * 0.1,
        'bg0': jax.random.normal(ks[1], (size_in,), F32) * 0.1 + 1.0,
        'wb0': jax.random.normal(ks[2], (c_dim, size_in), F32) * 0.1,
        'bb0': jax.random.normal(ks[3], (size_in,), F32) * 0.1,
        'w0':  jax.random.normal(ks[4], (size_h, size_in), F32) * 0.1,
        'b0':  jax.random.normal(ks[5], (size_h,), F32) * 0.1,
        'wg1': jax.random.normal(ks[6], (c_dim, size_h), F32) * 0.1,
        'bg1': jax.random.normal(ks[7], (size_h,), F32) * 0.1 + 1.0,
        'wb1': jax.random.normal(ks[8], (c_dim, size_h), F32) * 0.1,
        'bb1': jax.random.normal(ks[9], (size_h,), F32) * 0.1,
        'w1':  jax.random.normal(ks[10], (size_out, size_h), F32) * 0.1,
        'b1':  jax.random.normal(ks[11], (size_out,), F32) * 0.1,
        'ws':  jax.random.normal(ks[12], (size_out, size_in), F32) * 0.1,
    }

    x = jax.random.normal(ks[13], (B, size_in, T), F32)   # PyTorch NCL layout
    c = jax.random.normal(ks[14], (B, c_dim), F32)

    out = jax.jit(cresnet_block)(x, c, params)
    out = jax.block_until_ready(out)

    ref = reference(x, c, params)
    np.testing.assert_allclose(np.asarray(out), np.asarray(ref),
                               rtol=2e-4, atol=2e-4)

    print("KERNEL_OK")
</pallas_src>

<mosaic_0001>
module attributes {stable_mosaic.version = 11 : i64} {
  func.func @_stage0_kernel(%arg0: i32, %arg1: i32, %arg2: memref<1x16x512xf32, #tpu.memory_space<vmem>>, %arg3: memref<1x16x1xf32, #tpu.memory_space<vmem>>, %arg4: memref<1x16x1xf32, #tpu.memory_space<vmem>>, %arg5: memref<32x16xf32, #tpu.memory_space<vmem>>, %arg6: memref<32x1xf32, #tpu.memory_space<vmem>>, %arg7: memref<1x32x512xf32, #tpu.memory_space<vmem>>, %arg8: memref<1x1x32x2xf32, #tpu.memory_space<vmem>>) attributes {dimension_semantics = [#tpu.dimension_semantics<parallel>, #tpu.dimension_semantics<parallel>], iteration_bounds = array<i64: 2, 2>, scalar_prefetch = 0 : i64, scratch_operands = 0 : i64, tpu.core_type = #tpu.core_type<tc>, window_params = [{transform_indices = @transform_0, window_bounds = array<i64: 1, 16, 512>}, {transform_indices = @transform_1, window_bounds = array<i64: 1, 16, 1>}, {transform_indices = @transform_2, window_bounds = array<i64: 1, 16, 1>}, {pipeline_mode = #tpu.pipeline_mode<synchronous>, transform_indices = @transform_3, window_bounds = array<i64: 32, 16>}, {pipeline_mode = #tpu.pipeline_mode<synchronous>, transform_indices = @transform_4, window_bounds = array<i64: 32, 1>}, {transform_indices = @transform_5, window_bounds = array<i64: 1, 32, 512>}, {transform_indices = @transform_6, window_bounds = array<i64: 1, 1, 32, 2>}]} {
    %c0 = arith.constant 0 : index
    %c0_0 = arith.constant 0 : index
    %c0_1 = arith.constant 0 : index
    %0 = vector.load %arg2[%c0, %c0_0, %c0_1] : memref<1x16x512xf32, #tpu.memory_space<vmem>>, vector<1x16x512xf32>
    %1 = vector.shape_cast %0 : vector<1x16x512xf32> to vector<16x512xf32>
    %c0_2 = arith.constant 0 : index
    %c0_3 = arith.constant 0 : index
    %c0_4 = arith.constant 0 : index
    %2 = vector.load %arg3[%c0_2, %c0_3, %c0_4] : memref<1x16x1xf32, #tpu.memory_space<vmem>>, vector<1x16x1xf32>
    %3 = vector.shape_cast %2 : vector<1x16x1xf32> to vector<16x1xf32>
    %c0_5 = arith.constant 0 : index
    %c0_6 = arith.constant 0 : index
    %c0_7 = arith.constant 0 : index
    %4 = vector.load %arg4[%c0_5, %c0_6, %c0_7] : memref<1x16x1xf32, #tpu.memory_space<vmem>>, vector<1x16x1xf32>
    %5 = vector.shape_cast %4 : vector<1x16x1xf32> to vector<16x1xf32>
    %6 = vector.broadcast %3 : vector<16x1xf32> to vector<16x512xf32>
    %7 = arith.mulf %6, %1 : vector<16x512xf32>
    %8 = vector.broadcast %5 : vector<16x1xf32> to vector<16x512xf32>
    %9 = arith.addf %7, %8 : vector<16x512xf32>
    %cst = arith.constant 0.000000e+00 : f32
    %10 = vector.broadcast %cst : f32 to vector<16x512xf32>
    %11 = arith.maximumf %9, %10 : vector<16x512xf32>
    %c0_8 = arith.constant 0 : index
    %c0_9 = arith.constant 0 : index
    %12 = vector.load %arg5[%c0_8, %c0_9] : memref<32x16xf32, #tpu.memory_space<vmem>>, vector<32x16xf32>
    %cst_10 = arith.constant dense<0.000000e+00> : vector<32x512xf32>
    %13 = tpu.matmul %12, %11, %cst_10 {dimension_numbers = #tpu.dot_dimension_numbers<[1], [0], [0], [1], [0, 0, 1, 1], [], []>} : vector<32x16xf32>, vector<16x512xf32>, vector<32x512xf32> -> vector<32x512xf32>
    %c0_11 = arith.constant 0 : index
    %c0_12 = arith.constant 0 : index
    %14 = vector.load %arg6[%c0_11, %c0_12] : memref<32x1xf32, #tpu.memory_space<vmem>>, vector<32x1xf32>
    %15 = vector.broadcast %14 : vector<32x1xf32> to vector<32x512xf32>
    %16 = arith.addf %13, %15 : vector<32x512xf32>
    %c0_13 = arith.constant 0 : index
    %c0_14 = arith.constant 0 : index
    %c0_15 = arith.constant 0 : index
    %17 = vector.load %arg7[%c0_13, %c0_14, %c0_15] : memref<1x32x512xf32, #tpu.memory_space<vmem>>, vector<1x32x512xf32>
    %18 = vector.shape_cast %17 : vector<1x32x512xf32> to vector<32x512xf32>
    %19 = vector.shape_cast %16 : vector<32x512xf32> to vector<1x32x512xf32>
    tpu.vector_store %arg7[%c0_13, %c0_14, %c0_15], %19 {strides = array<i32>} : memref<1x32x512xf32, #tpu.memory_space<vmem>>, vector<1x32x512xf32>,
    %cst_16 = arith.constant dense<0.000000e+00> : vector<32xf32>
    %20 = vector.multi_reduction <add>, %16, %cst_16 [1] : vector<32x512xf32> to vector<32xf32>
    %21 = vector.shape_cast %20 : vector<32xf32> to vector<32x1xf32>
    %22 = arith.mulf %16, %16 : vector<32x512xf32>
    %cst_17 = arith.constant dense<0.000000e+00> : vector<32xf32>
    %23 = vector.multi_reduction <add>, %22, %cst_17 [1] : vector<32x512xf32> to vector<32xf32>
    %24 = vector.shape_cast %23 : vector<32xf32> to vector<32x1xf32>
    %25 = tpu.concatenate %21, %24 in 1 : vector<32x1xf32>, vector<32x1xf32> -> vector<32x2xf32>
    %c0_18 = arith.constant 0 : index
    %c0_19 = arith.constant 0 : index
    %c0_20 = arith.constant 0 : index
    %c0_21 = arith.constant 0 : index
    %26 = vector.load %arg8[%c0_18, %c0_19, %c0_20, %c0_21] : memref<1x1x32x2xf32, #tpu.memory_space<vmem>>, vector<1x1x32x2xf32>
    %27 = vector.shape_cast %26 : vector<1x1x32x2xf32> to vector<32x2xf32>
    %28 = vector.shape_cast %25 : vector<32x2xf32> to vector<1x1x32x2xf32>
    tpu.vector_store %arg8[%c0_18, %c0_19, %c0_20, %c0_21], %28 {strides = array<i32>} : memref<1x1x32x2xf32, #tpu.memory_space<vmem>>, vector<1x1x32x2xf32>,
    return
  }
  func.func @transform_0(%arg0: i32, %arg1: i32) -> (i32, i32, i32) {
    %c0_i32 = arith.constant 0 : i32
    %c0_i32_0 = arith.constant 0 : i32
    return %arg0, %c0_i32, %arg1 : i32, i32, i32
  }
  func.func @transform_1(%arg0: i32, %arg1: i32) -> (i32, i32, i32) {
    %c0_i32 = arith.constant 0 : i32
    %c0_i32_0 = arith.constant 0 : i32
    %c0_i32_1 = arith.constant 0 : i32
    return %arg0, %c0_i32, %c0_i32_0 : i32, i32, i32
  }
  func.func @transform_2(%arg0: i32, %arg1: i32) -> (i32, i32, i32) {
    %c0_i32 = arith.constant 0 : i32
    %c0_i32_0 = arith.constant 0 : i32
    %c0_i32_1 = arith.constant 0 : i32
    return %arg0, %c0_i32, %c0_i32_0 : i32, i32, i32
  }
  func.func @transform_3(%arg0: i32, %arg1: i32) -> (i32, i32) {
    %c0_i32 = arith.constant 0 : i32
    %c0_i32_0 = arith.constant 0 : i32
    %c0_i32_1 = arith.constant 0 : i32
    return %c0_i32, %c0_i32_0 : i32, i32
  }
  func.func @transform_4(%arg0: i32, %arg1: i32) -> (i32, i32) {
    %c0_i32 = arith.constant 0 : i32
    %c0_i32_0 = arith.constant 0 : i32
    %c0_i32_1 = arith.constant 0 : i32
    return %c0_i32, %c0_i32_0 : i32, i32
  }
  func.func @transform_5(%arg0: i32, %arg1: i32) -> (i32, i32, i32) {
    %c0_i32 = arith.constant 0 : i32
    %c0_i32_0 = arith.constant 0 : i32
    return %arg0, %c0_i32, %arg1 : i32, i32, i32
  }
  func.func @transform_6(%arg0: i32, %arg1: i32) -> (i32, i32, i32, i32) {
    %c0_i32 = arith.constant 0 : i32
    %c0_i32_0 = arith.constant 0 : i32
    %c0_i32_1 = arith.constant 0 : i32
    return %arg0, %arg1, %c0_i32, %c0_i32_0 : i32, i32, i32, i32
  }
}

module attributes {stable_mosaic.version = 11 : i64} {
  func.func @_stats_kernel(%arg0: i32, %arg1: i32, %arg2: memref<1x16x512xf32, #tpu.memory_space<vmem>>, %arg3: memref<1x1x16x2xf32, #tpu.memory_space<vmem>>) attributes {dimension_semantics = [#tpu.dimension_semantics<parallel>, #tpu.dimension_semantics<parallel>], iteration_bounds = array<i64: 2, 2>, scalar_prefetch = 0 : i64, scratch_operands = 0 : i64, tpu.core_type = #tpu.core_type<tc>, window_params = [{transform_indices = @transform_0, window_bounds = array<i64: 1, 16, 512>}, {transform_indices = @transform_1, window_bounds = array<i64: 1, 1, 16, 2>}]} {
    %c0 = arith.constant 0 : index
    %c0_0 = arith.constant 0 : index
    %c0_1 = arith.constant 0 : index
    %0 = vector.load %arg2[%c0, %c0_0, %c0_1] : memref<1x16x512xf32, #tpu.memory_space<vmem>>, vector<1x16x512xf32>
    %1 = vector.shape_cast %0 : vector<1x16x512xf32> to vector<16x512xf32>
    %cst = arith.constant dense<0.000000e+00> : vector<16xf32>
    %2 = vector.multi_reduction <add>, %1, %cst [1] : vector<16x512xf32> to vector<16xf32>
    %3 = vector.shape_cast %2 : vector<16xf32> to vector<16x1xf32>
    %4 = arith.mulf %1, %1 : vector<16x512xf32>
    %cst_2 = arith.constant dense<0.000000e+00> : vector<16xf32>
    %5 = vector.multi_reduction <add>, %4, %cst_2 [1] : vector<16x512xf32> to vector<16xf32>
    %6 = vector.shape_cast %5 : vector<16xf32> to vector<16x1xf32>
    %7 = tpu.concatenate %3, %6 in 1 : vector<16x1xf32>, vector<16x1xf32> -> vector<16x2xf32>
    %c0_3 = arith.constant 0 : index
    %c0_4 = arith.constant 0 : index
    %c0_5 = arith.constant 0 : index
    %c0_6 = arith.constant 0 : index
    %8 = vector.load %arg3[%c0_3, %c0_4, %c0_5, %c0_6] : memref<1x1x16x2xf32, #tpu.memory_space<vmem>>, vector<1x1x16x2xf32>
    %9 = vector.shape_cast %8 : vector<1x1x16x2xf32> to vector<16x2xf32>
    %10 = vector.shape_cast %7 : vector<16x2xf32> to vector<1x1x16x2xf32>
    tpu.vector_store %arg3[%c0_3, %c0_4, %c0_5, %c0_6], %10 {strides = array<i32>} : memref<1x1x16x2xf32, #tpu.memory_space<vmem>>, vector<1x1x16x2xf32>,
    return
  }
  func.func @transform_0(%arg0: i32, %arg1: i32) -> (i32, i32, i32) {
    %c0_i32 = arith.constant 0 : i32
    %c0_i32_0 = arith.constant 0 : i32
    return %arg0, %c0_i32, %arg1 : i32, i32, i32
  }
  func.func @transform_1(%arg0: i32, %arg1: i32) -> (i32, i32, i32, i32) {
    %c0_i32 = arith.constant 0 : i32
    %c0_i32_0 = arith.constant 0 : i32
    %c0_i32_1 = arith.constant 0 : i32
    return %arg0, %arg1, %c0_i32, %c0_i32_0 : i32, i32, i32, i32
  }
}

module attributes {stable_mosaic.version = 11 : i64} {
  func.func @_stage1_kernel(%arg0: i32, %arg1: i32, %arg2: memref<1x32x512xf32, #tpu.memory_space<vmem>>, %arg3: memref<1x16x512xf32, #tpu.memory_space<vmem>>, %arg4: memref<1x32x1xf32, #tpu.memory_space<vmem>>, %arg5: memref<1x32x1xf32, #tpu.memory_space<vmem>>, %arg6: memref<24x48xf32, #tpu.memory_space<vmem>>, %arg7: memref<24x1xf32, #tpu.memory_space<vmem>>, %arg8: memref<1x24x512xf32, #tpu.memory_space<vmem>>) attributes {dimension_semantics = [#tpu.dimension_semantics<parallel>, #tpu.dimension_semantics<parallel>], iteration_bounds = array<i64: 2, 2>, scalar_prefetch = 0 : i64, scratch_operands = 0 : i64, tpu.core_type = #tpu.core_type<tc>, window_params = [{transform_indices = @transform_0, window_bounds = array<i64: 1, 32, 512>}, {transform_indices = @transform_1, window_bounds = array<i64: 1, 16, 512>}, {transform_indices = @transform_2, window_bounds = array<i64: 1, 32, 1>}, {transform_indices = @transform_3, window_bounds = array<i64: 1, 32, 1>}, {pipeline_mode = #tpu.pipeline_mode<synchronous>, transform_indices = @transform_4, window_bounds = array<i64: 24, 48>}, {pipeline_mode = #tpu.pipeline_mode<synchronous>, transform_indices = @transform_5, window_bounds = array<i64: 24, 1>}, {transform_indices = @transform_6, window_bounds = array<i64: 1, 24, 512>}]} {
    %c0 = arith.constant 0 : index
    %c0_0 = arith.constant 0 : index
    %c0_1 = arith.constant 0 : index
    %0 = vector.load %arg2[%c0, %c0_0, %c0_1] : memref<1x32x512xf32, #tpu.memory_space<vmem>>, vector<1x32x512xf32>
    %1 = vector.shape_cast %0 : vector<1x32x512xf32> to vector<32x512xf32>
    %c0_2 = arith.constant 0 : index
    %c0_3 = arith.constant 0 : index
    %c0_4 = arith.constant 0 : index
    %2 = vector.load %arg3[%c0_2, %c0_3, %c0_4] : memref<1x16x512xf32, #tpu.memory_space<vmem>>, vector<1x16x512xf32>
    %3 = vector.shape_cast %2 : vector<1x16x512xf32> to vector<16x512xf32>
    %c0_5 = arith.constant 0 : index
    %c0_6 = arith.constant 0 : index
    %c0_7 = arith.constant 0 : index
    %4 = vector.load %arg4[%c0_5, %c0_6, %c0_7] : memref<1x32x1xf32, #tpu.memory_space<vmem>>, vector<1x32x1xf32>
    %5 = vector.shape_cast %4 : vector<1x32x1xf32> to vector<32x1xf32>
    %c0_8 = arith.constant 0 : index
    %c0_9 = arith.constant 0 : index
    %c0_10 = arith.constant 0 : index
    %6 = vector.load %arg5[%c0_8, %c0_9, %c0_10] : memref<1x32x1xf32, #tpu.memory_space<vmem>>, vector<1x32x1xf32>
    %7 = vector.shape_cast %6 : vector<1x32x1xf32> to vector<32x1xf32>
    %8 = vector.broadcast %5 : vector<32x1xf32> to vector<32x512xf32>
    %9 = arith.mulf %8, %1 : vector<32x512xf32>
    %10 = vector.broadcast %7 : vector<32x1xf32> to vector<32x512xf32>
    %11 = arith.addf %9, %10 : vector<32x512xf32>
    %cst = arith.constant 0.000000e+00 : f32
    %12 = vector.broadcast %cst : f32 to vector<32x512xf32>
    %13 = arith.maximumf %11, %12 : vector<32x512xf32>
    %14 = tpu.concatenate %13, %3 in 0 : vector<32x512xf32>, vector<16x512xf32> -> vector<48x512xf32>
    %c0_11 = arith.constant 0 : index
    %c0_12 = arith.constant 0 : index
    %15 = vector.load %arg6[%c0_11, %c0_12] : memref<24x48xf32, #tpu.memory_space<vmem>>, vector<24x48xf32>
    %cst_13 = arith.constant dense<0.000000e+00> : vector<24x512xf32>
    %16 = tpu.matmul %15, %14, %cst_13 {dimension_numbers = #tpu.dot_dimension_numbers<[1], [0], [0], [1], [0, 0, 1, 1], [], []>} : vector<24x48xf32>, vector<48x512xf32>, vector<24x512xf32> -> vector<24x512xf32>
    %c0_14 = arith.constant 0 : index
    %c0_15 = arith.constant 0 : index
    %17 = vector.load %arg7[%c0_14, %c0_15] : memref<24x1xf32, #tpu.memory_space<vmem>>, vector<24x1xf32>
    %18 = vector.broadcast %17 : vector<24x1xf32> to vector<24x512xf32>
    %19 = arith.addf %16, %18 : vector<24x512xf32>
    %c0_16 = arith.constant 0 : index
    %c0_17 = arith.constant 0 : index
    %c0_18 = arith.constant 0 : index
    %20 = vector.load %arg8[%c0_16, %c0_17, %c0_18] : memref<1x24x512xf32, #tpu.memory_space<vmem>>, vector<1x24x512xf32>
    %21 = vector.shape_cast %20 : vector<1x24x512xf32> to vector<24x512xf32>
    %22 = vector.shape_cast %19 : vector<24x512xf32> to vector<1x24x512xf32>
    tpu.vector_store %arg8[%c0_16, %c0_17, %c0_18], %22 {strides = array<i32>} : memref<1x24x512xf32, #tpu.memory_space<vmem>>, vector<1x24x512xf32>,
    return
  }
  func.func @transform_0(%arg0: i32, %arg1: i32) -> (i32, i32, i32) {
    %c0_i32 = arith.constant 0 : i32
    %c0_i32_0 = arith.constant 0 : i32
    return %arg0, %c0_i32, %arg1 : i32, i32, i32
  }
  func.func @transform_1(%arg0: i32, %arg1: i32) -> (i32, i32, i32) {
    %c0_i32 = arith.constant 0 : i32
    %c0_i32_0 = arith.constant 0 : i32
    return %arg0, %c0_i32, %arg1 : i32, i32, i32
  }
  func.func @transform_2(%arg0: i32, %arg1: i32) -> (i32, i32, i32) {
    %c0_i32 = arith.constant 0 : i32
    %c0_i32_0 = arith.constant 0 : i32
    %c0_i32_1 = arith.constant 0 : i32
    return %arg0, %c0_i32, %c0_i32_0 : i32, i32, i32
  }
  func.func @transform_3(%arg0: i32, %arg1: i32) -> (i32, i32, i32) {
    %c0_i32 = arith.constant 0 : i32
    %c0_i32_0 = arith.constant 0 : i32
    %c0_i32_1 = arith.constant 0 : i32
    return %arg0, %c0_i32, %c0_i32_0 : i32, i32, i32
  }
  func.func @transform_4(%arg0: i32, %arg1: i32) -> (i32, i32) {
    %c0_i32 = arith.constant 0 : i32
    %c0_i32_0 = arith.constant 0 : i32
    %c0_i32_1 = arith.constant 0 : i32
    return %c0_i32, %c0_i32_0 : i32, i32
  }
  func.func @transform_5(%arg0: i32, %arg1: i32) -> (i32, i32) {
    %c0_i32 = arith.constant 0 : i32
    %c0_i32_0 = arith.constant 0 : i32
    %c0_i32_1 = arith.constant 0 : i32
    return %c0_i32, %c0_i32_0 : i32, i32
  }
  func.func @transform_6(%arg0: i32, %arg1: i32) -> (i32, i32, i32) {
    %c0_i32 = arith.constant 0 : i32
    %c0_i32_0 = arith.constant 0 : i32
    return %arg0, %c0_i32, %arg1 : i32, i32, i32
  }
}

</mosaic_0001>

<bundles_post_ra>
// kernel: cresnet_block.3
= control target key start
LH: loop header
LB: loop body
LE: loop exit
PB: predicated region body
PF: predicated region fallthrough
CT: control target
= control target key end

     0   :  { %s452_s6 = smov 0   ;;  %s454_s7 = smov 0   ;;  %s543_s0 = inlined_call_operand.vmem [shape: f32[2,16,1024], index: 0, kind: input, shape index: {}]   ;;  %s544_s1 = inlined_call_operand.vmem [shape: f32[2,2,16,2], index: 1, kind: output, shape index: {}]  }
   0x1   :  { %s456_s8 = smov 0   ;;  %s458_s9 = smov 0  }
   0x2   :  { %s460_s10 = smov 0   ;;  %s462_s11 = smov 0  }
   0x3   :  { %s464_s12 = smov 0  }
   0x4 LB: > { %s20_s13 = sadd.s32 1, %s432_s10  ;;  %s23_s14 = sadd.s32 1, %s436_s11  ;;  %s440_s12 = sphi %s464_s12, %s11_s12   ;;  %s436_s11 = sphi %s462_s11, %s550_s11   ;;  %s432_s10 = sphi %s460_s10, %s549_s10   ;;  %s428_s9 = sphi %s458_s9, %s548_s9   ;;  %s424_s8 = sphi %s456_s8, %s547_s8   ;;  %s420_s7 = sphi %s454_s7, %s546_s7   ;;  %s416_s6 = sphi %s452_s6, %s545_s6  }
   0x5   : > { %p21_p0 = scmp.ge.s32.totalorder %s20_s13, 2  ;;  %p39_p1 = scmp.ne.s32.totalorder %s420_s7, %s416_s6 }
   0x6   : > { %p40_p2 = scmp.eq.s32.totalorder %s440_s12, 0  ;;  %s32_s18 = sadd.s32 1, %s420_s7 }
   0x7   : > { %s552_s13 = smov (%p21_p0, %s20_s13), 0  ;;  %s554_s14 = smov (!%p21_p0, %s23_s14), %s436_s11 }
   0x8   : > { %p41_p3 = por %p40_p2, %p39_p1  ;;  %p25_p4 = scmp.ge.s32.totalorder %s554_s14, 2 }
   0x9   : > { %s28_s15 = ssub.s32 %s432_s10, %s552_s13  ;;  %p318_p6 = scmp.ge.s32.totalorder %s440_s12, 4 }
   0xa   : > { %s556_s14 = smov (%p25_p4, %s554_s14), 0 }
   0xb   : > { %s27_s16 = ssub.s32 %s436_s11, %s556_s14  ;;  %93 = sbr.rel (%p318_p6) target bundleno = 29 (0x1d), region = 16 }
   0xc   : > { %s29_s17 = sor.u32 %s28_s15, %s27_s16 }
   0xd   : > { %p30_p5 = scmp.eq.s32.totalorder %s29_s17, 0 }
   0xf   : > { %s503_s19 = scalar_select %p30_p5, %s420_s7, %s32_s18  }
  0x12   : > { %96 = sbr.rel (!%p41_p3) target bundleno = 29 (0x1d), region = 20  ;;  %s98_s20 = sand.u32 (%p41_p3), 1, %s420_s7  }
  0x13   : > { %s320_s21 = sshll.u32 (%p41_p3), %s432_s10, 2  ;;  %s319_s22 = sshll.u32 (%p41_p3), %s98_s20, 6 }
  0x14   : > { %s321_s23 = sshll.u32 (%p41_p3), %s436_s11, 4  ;;  %s100_s29 = scalar_lea.vmem (%p41_p3), [#allocation2], %s319_s22 }
  0x15   : > { %s103_s24 = sadd.s32 (%p41_p3), %s321_s23, %s320_s21 }
  0x16   : > { %s322_s25 = sshll.u32 (%p41_p3), %s103_s24, 3 }
  0x17   : > { %s105_s28 = scalar_lea.vmem (%p41_p3), %s543_s0, %s322_s25 }
  0x18   : > { %v118_v0 = vld [vmem:[%s105_s28] sm:$0xff] (%p41_p3)  ;;  %v120_v1 = vld [vmem:[%s105_s28 + $0x8] sm:$0xff] (%p41_p3)  ;;  %v122_v2 = vld [vmem:[%s105_s28 + $0x10] sm:$0xff] (%p41_p3) }
  0x19   : > { %119 = vst [vmem:[%s100_s29] sm:$0xff] %v118_v0  ;;  %121 = vst [vmem:[%s100_s29 + $0x8] sm:$0xff] %v120_v1  ;;  %v124_v3 = vld [vmem:[%s105_s28 + $0x18] sm:$0xff]  ;;  %v126_v4 = vld [vmem:[%s105_s28 + $0x40] sm:$0xff] }
  0x1a   : > { %123 = vst [vmem:[%s100_s29 + $0x10] sm:$0xff] %v122_v2  ;;  %v128_v5 = vld [vmem:[%s105_s28 + $0x48] sm:$0xff]  ;;  %125 = vst [vmem:[%s100_s29 + $0x18] sm:$0xff] %v124_v3  ;;  %v130_v6 = vld [vmem:[%s105_s28 + $0x50] sm:$0xff] }
  0x1b   : > { %127 = vst [vmem:[%s100_s29 + $0x20] sm:$0xff] %v126_v4  ;;  %129 = vst [vmem:[%s100_s29 + $0x28] sm:$0xff] %v128_v5  ;;  %v132_v7 = vld [vmem:[%s105_s28 + $0x58] sm:$0xff] }
  0x1c   : > { %131 = vst [vmem:[%s100_s29 + $0x30] sm:$0xff] %v130_v6  ;;  %133 = vst [vmem:[%s100_s29 + $0x38] sm:$0xff] %v132_v7 }
  0x1d PF: > { %p323_p7 = scmp.ge.s32.totalorder %s440_s12, 1  ;;  %p138_p8 = scmp.lt.s32.totalorder %s440_s12, 5 }
  0x1f   : > { %p139_p9 = pnand %p323_p7, %p138_p8 }
  0x20   : > { %s145_s30 = sand.u32 (!%p139_p9), 1, %s416_s6   ;;  %p169_p10 = scmp.lt.s32.totalorder (!%p139_p9), %s428_s9, 1  ;;  %vm214_vm0 = vcmask (!%p139_p9), 7168   ;;  %vm217_vm1 = vcmask (!%p139_p9), 15360  }
  0x21   : > { %142 = sbr.rel (%p139_p9) target bundleno = 192 (0xc0), region = 43  ;;  %s324_s2 = sshll.u32 (!%p139_p9), %s145_s30, 6 }
  0x22   : > { %s147_s3 = scalar_lea.vmem (!%p139_p9), [#allocation2], %s324_s2  ;;  %p171_p11 = scmp.lt.s32.totalorder (!%p139_p9), %s424_s8, 1 }
  0x23   : > { %v178_v8 = vld [vmem:[%s147_s3] sm:$0xff] (!%p139_p9)  ;;  %v179_v9 = vld [vmem:[%s147_s3 + $0x8] sm:$0xff] (!%p139_p9)  ;;  %v180_v10 = vld [vmem:[%s147_s3 + $0x10] sm:$0xff] (!%p139_p9) }
  0x24   : > { %v181_v11 = vld [vmem:[%s147_s3 + $0x18] sm:$0xff] (!%p139_p9)  ;;  %v196_v12 = vmul.f32 (!%p139_p9), %v178_v8, %v178_v8  ;;  %v197_v13 = vmul.f32 (!%p139_p9), %v179_v9, %v179_v9  ;;  %v198_v14 = vmul.f32 (!%p139_p9), %v180_v10, %v180_v10  ;;  %v186_v15 = vadd.f32 (!%p139_p9), %v179_v9, %v178_v8  ;;  %v182_v16 = vld [vmem:[%s147_s3 + $0x20] sm:$0xff] (!%p139_p9)  ;;  %v183_v17 = vld [vmem:[%s147_s3 + $0x28] sm:$0xff] (!%p139_p9) }
  0x25   : > { %v184_v18 = vld [vmem:[%s147_s3 + $0x30] sm:$0xff] (!%p139_p9)  ;;  %v185_v19 = vld [vmem:[%s147_s3 + $0x38] sm:$0xff] (!%p139_p9)  ;;  %v200_v20 = vmul.f32 (!%p139_p9), %v182_v16, %v182_v16  ;;  %v201_v21 = vmul.f32 (!%p139_p9), %v183_v17, %v183_v17  ;;  %v191_v22 = vadd.f32 (!%p139_p9), %v183_v17, %v182_v16  ;;  %v199_v23 = vmul.f32 (!%p139_p9), %v181_v11, %v181_v11 }
  0x26   : > { %v204_v24 = vadd.f32 (!%p139_p9), %v197_v13, %v196_v12  ;;  %v187_v25 = vadd.f32 (!%p139_p9), %v186_v15, %v180_v10  ;;  %v202_v26 = vmul.f32 (!%p139_p9), %v184_v18, %v184_v18  ;;  %v203_v31 = vmul.f32 (!%p139_p9), %v185_v19, %v185_v19 }
  0x27   : > { %v209_v27 = vadd.f32 (!%p139_p9), %v201_v21, %v200_v20  ;;  %v192_v28 = vadd.f32 (!%p139_p9), %v191_v22, %v184_v18 }
  0x28   : > { %v205_v29 = vadd.f32 %v204_v24, %v198_v14  ;;  %v188_v30 = vadd.f32 %v187_v25, %v181_v11  ;;  %s558_s9 = smov (!%p169_p10, %s428_s9), 1  ;;  %s560_s8 = smov (!%p171_p11, %s424_s8), 1 }
  0x29   : > { %v210_v32 = vadd.f32 %v209_v27, %v202_v26  ;;  %v193_v34 = vadd.f32 %v192_v28, %v185_v19  ;;  %s325_s4 = sshll.u32 %s560_s8, 1  ;;  %s326_s5 = sshll.u32 %s558_s9, 2 }
  0x2a   : > { %v206_v33 = vadd.f32 %v205_v29, %v199_v23  ;;  %189 = vadd.xlane.f32.xlu0 %v188_v30  ;;  %s175_s6 = sadd.s32 %s326_s5, %s325_s4 }
  0x2b   : > { %v211_v35 = vadd.f32 %v210_v32, %v203_v31  ;;  %s327_s15 = sshll.u32 %s175_s6, 3 }
  0x2c   : > { %207 = vadd.xlane.f32.xlu1 %v206_v33  ;;  %s177_s18 = scalar_lea.vmem %s544_s1, %s327_s15 }
  0x2e   : > { %194 = vadd.xlane.f32.xlu0 %v193_v34 }
  0x30   : > { %212 = vadd.xlane.f32.xlu1 %v211_v35 }
  0xb7   : > { %v190_v36 = vpop.xlane.xlu0 %189 }
  0xb9   : > { %v208_v37 = vpop.xlane.xlu1 %207 }
  0xba   : > { %v215_v38 = vsel %vm214_vm0, %v190_v36, %v208_v37 }
  0xbb   : > { %218 = vst.msk [vmem:[%s177_s18] sm:$0xff] %vm217_vm1, %v215_v38  ;;  %v195_v39 = vpop.xlane.xlu0 %194 }
  0xbd   : > { %v213_v40 = vpop.xlane.xlu1 %212 }
  0xbe   : > { %v216_v41 = vsel %vm214_vm0, %v195_v39, %v213_v40 }
  0xbf   : > { %219 = vst.msk [vmem:[%s177_s18 + $0x8] sm:$0xff] %vm217_vm1, %v216_v41 }
  0xc0 PF: > { %s11_s12 = sadd.s32 1, %s440_s12   ;;  %s545_s6 = smov %s420_s7 }
  0xc1   : > { %p8_p12 = scmp.ge.s32.totalorder %s11_s12, 6   ;;  %s546_s7 = smov %s503_s19 }
  0xc2   : > { %s547_s8 = smov %s432_s10  ;;  %s548_s9 = smov %s436_s11 }
  0xc3   : > { %s549_s10 = smov %s552_s13  ;;  %s550_s11 = smov %s556_s14 }
  0xc4   :  { %10 = sbr.rel (!%p8_p12) target bundleno = 4 (0x4), region = 82 }

// kernel: cresnet_block.4
= control target key start
LH: loop header
LB: loop body
LE: loop exit
PB: predicated region body
PF: predicated region fallthrough
CT: control target
= control target key end

     0   :  { %s1125_s21 = smov 0   ;;  %s1127_s22 = smov 0   ;;  %s1324_s0 = inlined_call_operand.vmem [shape: f32[2,16,1024], index: 0, kind: input, shape index: {}]   ;;  %s1325_s1 = inlined_call_operand.vmem [shape: f32[2,16,1], index: 1, kind: input, shape index: {}]   ;;  %s1326_s2 = inlined_call_operand.vmem [shape: f32[2,16,1], index: 2, kind: input, shape index: {}]   ;;  %s1327_s3 = inlined_call_operand.vmem [shape: f32[32,16], index: 3, kind: input, shape index: {}]   ;;  %s1328_s4 = inlined_call_operand.vmem [shape: f32[32,1], index: 4, kind: input, shape index: {}]   ;;  %s1329_s5 = inlined_call_operand.vmem [shape: f32[2,32,1024], index: 5, kind: output, shape index: {0}]   ;;  %s1330_s6 = inlined_call_operand.vmem [shape: f32[2,2,32,2], index: 6, kind: output, shape index: {1}]  }
   0x1   :  { %s1129_s23 = smov 0   ;;  %s1131_s24 = smov 0  }
   0x2   :  { %s1133_s25 = smov 0   ;;  %s1135_s26 = smov 0  }
   0x3   :  { %s1137_s27 = smov 0  }
   0x4 LB: > { %s26_s28 = sadd.s32 1, %s1078_s25  ;;  %s29_s29 = sadd.s32 1, %s1082_s26  ;;  %s1086_s27 = sphi %s1137_s27, %s17_s27   ;;  %s1082_s26 = sphi %s1135_s26, %s1337_s26   ;;  %s1078_s25 = sphi %s1133_s25, %s1336_s25   ;;  %s1074_s24 = sphi %s1131_s24, %s1335_s24   ;;  %s1070_s23 = sphi %s1129_s23, %s1334_s23   ;;  %s1066_s22 = sphi %s1127_s22, %s1333_s22   ;;  %s1062_s21 = sphi %s1125_s21, %s1332_s21  }
   0x5   : > { %p27_p0 = scmp.ge.s32.totalorder %s26_s28, 2  ;;  %s930_s30 = sadd.s32 4294967295, %s1086_s27  }
   0x6   : > { %p45_p1 = scmp.ne.s32.totalorder %s1066_s22, %s1062_s21  ;;  %p46_p2 = scmp.eq.s32.totalorder %s1086_s27, 0 }
   0x7   : > { %s1339_s28 = smov (%p27_p0, %s26_s28), 0  ;;  %s1341_s29 = smov (!%p27_p0, %s29_s29), %s1082_s26 }
   0x8   : > { %p31_p3 = scmp.ge.s32.totalorder %s1341_s29, 2  ;;  %p171_p4 = scmp.eq.s32.totalorder %s930_s30, 3 }
   0x9   : > { %s34_s7 = ssub.s32 %s1078_s25, %s1339_s28  ;;  %p47_p5 = por %p46_p2, %p45_p1 }
   0xa   : > { %s1343_s29 = smov (%p31_p3, %s1341_s29), 0  ;;  %p1173_p6 = por %p171_p4, %p45_p1 }
   0xb   : > { %s33_s9 = ssub.s32 %s1082_s26, %s1343_s29  ;;  %s38_s11 = sadd.s32 1, %s1066_s22 }
   0xc   : > { %s35_s10 = sor.u32 %s34_s7, %s33_s9  ;;  %p933_p8 = scmp.ge.s32.totalorder %s1086_s27, 4 }
   0xd   : > { %p36_p7 = scmp.eq.s32.totalorder %s35_s10, 0 }
   0xe   : > { %227 = sbr.rel (%p933_p8) target bundleno = 32 (0x20), region = 24 }
   0xf   : > { %s1181_s12 = scalar_select %p36_p7, %s1066_s22, %s38_s11  }
  0x15   : > { %230 = sbr.rel (!%p47_p5) target bundleno = 32 (0x20), region = 28  ;;  %s232_s13 = sand.u32 (%p47_p5), 1, %s1066_s22  }
  0x16   : > { %s935_s14 = sshll.u32 (%p47_p5), %s1078_s25, 2  ;;  %s934_s15 = sshll.u32 (%p47_p5), %s232_s13, 6 }
  0x17   : > { %s936_s16 = sshll.u32 (%p47_p5), %s1082_s26, 4  ;;  %s234_s7 = scalar_lea.vmem (%p47_p5), [#allocation2], %s934_s15 }
  0x18   : > { %s237_s17 = sadd.s32 (%p47_p5), %s936_s16, %s935_s14 }
  0x19   : > { %s937_s18 = sshll.u32 (%p47_p5), %s237_s17, 3 }
  0x1a   : > { %s239_s30 = scalar_lea.vmem (%p47_p5), %s1324_s0, %s937_s18 }
  0x1b   : > { %v252_v0 = vld [vmem:[%s239_s30] sm:$0xff] (%p47_p5)  ;;  %v254_v1 = vld [vmem:[%s239_s30 + $0x8] sm:$0xff] (%p47_p5)  ;;  %v256_v2 = vld [vmem:[%s239_s30 + $0x10] sm:$0xff] (%p47_p5) }
  0x1c   : > { %253 = vst [vmem:[%s234_s7] sm:$0xff] %v252_v0  ;;  %255 = vst [vmem:[%s234_s7 + $0x8] sm:$0xff] %v254_v1  ;;  %v258_v3 = vld [vmem:[%s239_s30 + $0x18] sm:$0xff]  ;;  %v260_v4 = vld [vmem:[%s239_s30 + $0x40] sm:$0xff] }
  0x1d   : > { %257 = vst [vmem:[%s234_s7 + $0x10] sm:$0xff] %v256_v2  ;;  %v262_v5 = vld [vmem:[%s239_s30 + $0x48] sm:$0xff]  ;;  %259 = vst [vmem:[%s234_s7 + $0x18] sm:$0xff] %v258_v3  ;;  %v264_v6 = vld [vmem:[%s239_s30 + $0x50] sm:$0xff] }
  0x1e   : > { %261 = vst [vmem:[%s234_s7 + $0x20] sm:$0xff] %v260_v4  ;;  %263 = vst [vmem:[%s234_s7 + $0x28] sm:$0xff] %v262_v5  ;;  %v266_v7 = vld [vmem:[%s239_s30 + $0x58] sm:$0xff] }
  0x1f   : > { %265 = vst [vmem:[%s234_s7 + $0x30] sm:$0xff] %v264_v6  ;;  %267 = vst [vmem:[%s234_s7 + $0x38] sm:$0xff] %v266_v7 }
  0x20 PF: > { %p938_p9 = scmp.ge.s32.totalorder %s1086_s27, 1  ;;  %p288_p10 = scmp.lt.s32.totalorder %s1086_s27, 5 }
  0x22   : > { %p289_p11 = pnand %p938_p9, %p288_p10 }
  0x23   : > { %p343_p12 = scmp.lt.s32.totalorder (!%p289_p11), %s1074_s24, 1  ;;  %v1088_v8 = vmov (!%p289_p11), 0   ;;  %v424_v13 = vld [vmem:[%s1328_s4 + $0x8] sm:$0xff] (!%p289_p11)  ;;  %v423_v14 = vld [vmem:[%s1328_s4] sm:$0xff] (!%p289_p11)  ;;  %v426_v15 = vld [vmem:[%s1328_s4 + $0x18] sm:$0xff] (!%p289_p11)  ;;  %v1089_v17 = vmov (!%p289_p11), 0.0  }
  0x24   : > { %292 = sbr.rel (%p289_p11) target bundleno = 577 (0x241), region = 59  ;;  %1031 = vset.pattern.permute.xlu1 (!%p289_p11), %v1088_v8  ;;  %1030 = vset.pattern.permute.xlu0 (!%p289_p11), %v1088_v8  ;;  %v425_v16 = vld [vmem:[%s1328_s4 + $0x10] sm:$0xff] (!%p289_p11)  ;;  %v419_v58 = vld [vmem:[%s1327_s3] sm:$0xff] (!%p289_p11)  ;;  %vm447_vm0 = vcmask (!%p289_p11), 130048   ;;  %v420_v59 = vld [vmem:[%s1327_s3 + $0x8] sm:$0xff] (!%p289_p11)  ;;  %p356_p13 = scmp.lt.s32.totalorder (!%p289_p11), %s1070_s23, 1 }
  0x25   : > { %524 = vmatprep.mubr.f32.mxu0 (!%p289_p11), %v1089_v17  ;;  %613 = vmatprep.mubr.f32.mxu1 (!%p289_p11), %v1089_v17  ;;  %v421_v60 = vld [vmem:[%s1327_s3 + $0x10] sm:$0xff] (!%p289_p11)  ;;  %v422_v61 = vld [vmem:[%s1327_s3 + $0x18] sm:$0xff] (!%p289_p11)  ;;  %vm710_vm1 = vcmask (!%p289_p11), 7168   ;;  %vm715_vm2 = vcmask (!%p289_p11), 15360  }
  0x2b   : > { %s1194_s9 = scalar_select %p343_p12, %s1074_s24, 1 }
  0x2c   : > { %s958_s7 = sshll.u32 (%p1173_p6), %s1074_s24, 5 }
  0x2d   : > { %s962_s10 = sshll.u32 %s1194_s9, 4 }
  0x2e   : > { %s352_s14 = scalar_lea.vmem %s1326_s2, %s962_s10  ;;  %s347_s17 = scalar_lea.vmem %s1325_s1, %s962_s10 }
  0x2f   : > { %v373_v9 = vld [vmem:[%s352_s14] sm:$0xff]  ;;  %v374_v11 = vld [vmem:[%s352_s14 + $0x8] sm:$0xff]  ;;  %s295_s14 = sand.u32 1, %s1062_s21  }
  0x30   : > { %395 = vperm.xlu1 %1031, %v373_v9   ;;  %v371_v10 = vld [vmem:[%s347_s17] sm:$0xff]  ;;  %v372_v12 = vld [vmem:[%s347_s17 + $0x8] sm:$0xff]  ;;  %s939_s15 = sshll.u32 %s295_s14, 6  ;;  %s940_s13 = sshll.u32 %s295_s14, 7 }
  0x31   : > { %377 = vperm.xlu0 %1030, %v371_v10   ;;  %s297_s16 = scalar_lea.vmem [#allocation2], %s939_s15  ;;  %s1248_s15 = scalar_lea.vmem [#allocation3], %s940_s13 }
  0x32   : > { %v363_v18 = vld [vmem:[%s297_s16] sm:$0xff]  ;;  %v365_v19 = vld [vmem:[%s297_s16 + $0x10] sm:$0xff]  ;;  %v364_v20 = vld [vmem:[%s297_s16 + $0x8] sm:$0xff]  ;;  %s357_s21 = scalar_select %p356_p13, %s1070_s23, 1 }
  0x33   : > { %v366_v21 = vld [vmem:[%s297_s16 + $0x18] sm:$0xff]  ;;  %v367_v27 = vld [vmem:[%s297_s16 + $0x20] sm:$0xff]  ;;  %v369_v28 = vld [vmem:[%s297_s16 + $0x30] sm:$0xff] }
  0x34   : > { %400 = vperm.xlu1 %1031, %v374_v11   ;;  %v368_v29 = vld [vmem:[%s297_s16 + $0x28] sm:$0xff]  ;;  %v370_v31 = vld [vmem:[%s297_s16 + $0x38] sm:$0xff]  ;;  %s945_s14 = sshll.u32 %s357_s21, 2  ;;  %s946_s16 = sshll.u32 %s1194_s9, 3 }
  0x35   : > { %382 = vperm.xlu0 %1030, %v372_v12   ;;  %s360_s17 = sadd.s32 %s946_s16, %s945_s14  ;;  %s957_s9 = sshll.u32 (%p1173_p6), %s1070_s23, 2 }
  0x36   : > { %s947_s18 = sshll.u32 %s360_s17, 3  ;;  %s738_s8 = sadd.s32 (%p1173_p6), %s958_s7, %s957_s9 }
  0x37   : > { %s362_s30 = scalar_lea.vmem %s1330_s6, %s947_s18  ;;  %s959_s10 = sshll.u32 (%p1173_p6), %s738_s8, 3 }
  0x38   : > { %434 = vperm.xlu1 %1031, %v424_v13   ;;  %s740_s21 = scalar_lea.vmem (%p1173_p6), %s1329_s5, %s959_s10 }
  0x39   : > { %429 = vperm.xlu0 %1030, %v423_v14  }
  0x3c   : > { %444 = vperm.xlu1 %1031, %v426_v15  }
  0x3d   : > { %439 = vperm.xlu0 %1030, %v425_v16  }
  0xaf   : > { %v396_v22 = vpop.permute.xlu1 %395 }
  0xb0   : > { %v378_v23 = vpop.permute.xlu0 %377 }
  0xb1   : > { %v385_v24 = vmul.f32 %v378_v23, %v363_v18  ;;  %v387_v25 = vmul.f32 %v378_v23, %v365_v19  ;;  %v386_v26 = vmul.f32 %v378_v23, %v364_v20  ;;  %v388_v30 = vmul.f32 %v378_v23, %v366_v21 }
  0xb3   : > { %v404_v33 = vadd.f32 %v396_v22, %v386_v26  ;;  %v403_v34 = vadd.f32 %v396_v22, %v385_v24  ;;  %v405_v38 = vadd.f32 %v396_v22, %v387_v25  ;;  %v401_v39 = vpop.permute.xlu1 %400  ;;  %v406_v41 = vadd.f32 %v396_v22, %v388_v30 }
  0xb4   : > { %v383_v32 = vpop.permute.xlu0 %382 }
  0xb5   : > { %v389_v35 = vmul.f32 %v383_v32, %v367_v27  ;;  %v391_v36 = vmul.f32 %v383_v32, %v369_v28  ;;  %v390_v37 = vmul.f32 %v383_v32, %v368_v29  ;;  %v392_v40 = vmul.f32 %v383_v32, %v370_v31 }
  0xb6   : > { %v412_v45 = vmax.f32 %v404_v33, 0.0  ;;  %v411_v47 = vmax.f32 %v403_v34, 0.0  ;;  %v413_v50 = vmax.f32 %v405_v38, 0.0  ;;  %v414_v52 = vmax.f32 %v406_v41, 0.0 }
  0xb7   : > { %v408_v42 = vadd.f32 %v401_v39, %v390_v37  ;;  %v407_v43 = vadd.f32 %v401_v39, %v389_v35  ;;  %v409_v44 = vadd.f32 %v401_v39, %v391_v36  ;;  %v410_v46 = vadd.f32 %v401_v39, %v392_v40  ;;  %v435_v8 = vpop.permute.xlu1 %434 }
  0xb8   : > { %v430_v62 = vpop.permute.xlu0 %429 }
  0xb9   : > { %v416_v48 = vmax.f32 %v408_v42, 0.0  ;;  %v415_v49 = vmax.f32 %v407_v43, 0.0  ;;  %v417_v51 = vmax.f32 %v409_v44, 0.0  ;;  %v418_v53 = vmax.f32 %v410_v46, 0.0 }
  0xbb   : > { %v964_v54 = vpack.c.bf16 %v416_v48, %v412_v45  ;;  %v966_v55 = vpack.c.bf16 %v415_v49, %v411_v47  ;;  %v970_v56 = vpack.c.bf16 %v417_v51, %v413_v50  ;;  %v968_v57 = vpack.c.bf16 %v418_v53, %v414_v52  ;;  %v445_v42 = vpop.permute.xlu1 %444 }
  0xbc   : > { %v440_v23 = vpop.permute.xlu0 %439 }
  0xbd   : > { %965 = vmatprep.subr.bf16.mxu0 %v964_v54  ;;  %969 = vmatprep.subr.bf16.mxu1 %v968_v57 }
  0xbe   : > { %967 = vmatpush1.bf16.msra.mxu0 %v966_v55  ;;  %971 = vmatpush1.bf16.msra.mxu1 %v970_v56 }
  0xc1   : > { %948 = vmatmul.mubr.msk.f32.vlgmr.msra.gmra.mrb[0].mxu0 %vm447_vm0, %v419_v58  ;;  %952 = vmatmul.mubr.msk.f32.vlgmr.msra.gmra.mrb[0].mxu1 %vm447_vm0, %v419_v58 }
  0xc2   : > { %530 = vmatprep.mubr.f32.mxu0 %v1089_v17  ;;  %619 = vmatprep.mubr.f32.mxu1 %v1089_v17 }
  0xc5   : > { %949 = vmatmul.mubr.msk.f32.gmra.mrb[2].mxu0 %vm447_vm0, %v420_v59  ;;  %953 = vmatmul.mubr.msk.f32.gmra.mrb[2].mxu1 %vm447_vm0, %v420_v59 }
  0xc6   : > { %536 = vmatprep.mubr.f32.mxu0 %v1089_v17  ;;  %625 = vmatprep.mubr.f32.mxu1 %v1089_v17 }
  0xc9   : > { %950 = vmatmul.mubr.msk.f32.gmra.mrb[4].mxu0 %vm447_vm0, %v421_v60  ;;  %954 = vmatmul.mubr.msk.f32.gmra.mrb[4].mxu1 %vm447_vm0, %v421_v60 }
  0xca   : > { %542 = vmatprep.mubr.f32.mxu0 %v1089_v17  ;;  %631 = vmatprep.mubr.f32.mxu1 %v1089_v17 }
  0xcd   : > { %951 = vmatmul.mubr.msk.f32.gmra.mrb[6].mxu0 %vm447_vm0, %v422_v61  ;;  %955 = vmatmul.mubr.msk.f32.gmra.mrb[6].mxu1 %vm447_vm0, %v422_v61 }
 0x194   : > { %v526_v63 = vpop.f32.mrb[0].mxu0  ;;  %v615_v1 = vpop.f32.mrb[0].mxu1 }
 0x195   : > { %v527_v0 = vadd.f32 %v526_v63, %v430_v62  ;;  %v528_v2 = vpop.f32.mrb[1].mxu0  ;;  %v616_v3 = vadd.f32 %v615_v1, %v430_v62  ;;  %v617_v5 = vpop.f32.mrb[1].mxu1 }
 0x196   : > { %v529_v4 = vadd.f32 %v528_v2, %v430_v62  ;;  %v618_v7 = vadd.f32 %v617_v5, %v430_v62 }
 0x197   : > { %638 = vst [vmem:[%s1248_s15] sm:$0xff] %v527_v0  ;;  %v674_v6 = vmul.f32 %v527_v0, %v527_v0  ;;  %640 = vst [vmem:[%s1248_s15 + $0x10] sm:$0xff] %v616_v3  ;;  %v676_v20 = vmul.f32 %v616_v3, %v616_v3 }
 0x198   : > { %639 = vst [vmem:[%s1248_s15 + $0x8] sm:$0xff] %v529_v4  ;;  %v654_v9 = vadd.f32 %v529_v4, %v527_v0  ;;  %v675_v10 = vmul.f32 %v529_v4, %v529_v4  ;;  %v532_v11 = vpop.f32.mrb[2].mxu0  ;;  %641 = vst [vmem:[%s1248_s15 + $0x18] sm:$0xff] %v618_v7  ;;  %v621_v13 = vpop.f32.mrb[2].mxu1  ;;  %v677_v31 = vmul.f32 %v618_v7, %v618_v7 }
 0x199   : > { %v533_v12 = vadd.f32 %v532_v11, %v435_v8  ;;  %v534_v14 = vpop.f32.mrb[3].mxu0  ;;  %v622_v15 = vadd.f32 %v621_v13, %v435_v8  ;;  %v623_v17 = vpop.f32.mrb[3].mxu1 }
 0x19a   : > { %v535_v16 = vadd.f32 %v534_v14, %v435_v8  ;;  %v655_v18 = vadd.f32 %v654_v9, %v616_v3  ;;  %v690_v19 = vadd.f32 %v675_v10, %v674_v6  ;;  %v624_v22 = vadd.f32 %v623_v17, %v435_v8 }
 0x19b   : > { %642 = vst [vmem:[%s1248_s15 + $0x20] sm:$0xff] %v533_v12  ;;  %v678_v21 = vmul.f32 %v533_v12, %v533_v12  ;;  %644 = vst [vmem:[%s1248_s15 + $0x30] sm:$0xff] %v622_v15  ;;  %v680_v38 = vmul.f32 %v622_v15, %v622_v15 }
 0x19c   : > { %643 = vst [vmem:[%s1248_s15 + $0x28] sm:$0xff] %v535_v16  ;;  %v659_v24 = vadd.f32 %v535_v16, %v533_v12  ;;  %v679_v25 = vmul.f32 %v535_v16, %v535_v16  ;;  %v538_v26 = vpop.f32.mrb[4].mxu0  ;;  %v656_v27 = vadd.f32 %v655_v18, %v618_v7  ;;  %645 = vst [vmem:[%s1248_s15 + $0x38] sm:$0xff] %v624_v22  ;;  %v627_v29 = vpop.f32.mrb[4].mxu1 }
 0x19d   : > { %v539_v28 = vadd.f32 %v538_v26, %v440_v23  ;;  %v540_v30 = vpop.f32.mrb[5].mxu0  ;;  %v691_v32 = vadd.f32 %v690_v19, %v676_v20  ;;  %v628_v33 = vadd.f32 %v627_v29, %v440_v23  ;;  %v629_v35 = vpop.f32.mrb[5].mxu1  ;;  %v681_v51 = vmul.f32 %v624_v22, %v624_v22 }
 0x19e   : > { %v541_v34 = vadd.f32 %v540_v30, %v440_v23  ;;  %657 = vadd.xlane.f32.xlu0 %v656_v27  ;;  %v660_v36 = vadd.f32 %v659_v24, %v622_v15  ;;  %v695_v37 = vadd.f32 %v679_v25, %v678_v21  ;;  %v630_v40 = vadd.f32 %v629_v35, %v440_v23  ;;  %v757_v24 = vld [vmem:[%s1248_s15 + $0x10] sm:$0xff] (%p1173_p6) }
 0x19f   : > { %646 = vst [vmem:[%s1248_s15 + $0x40] sm:$0xff] %v539_v28  ;;  %v682_v39 = vmul.f32 %v539_v28, %v539_v28  ;;  %v692_v41 = vadd.f32 %v691_v32, %v677_v31  ;;  %648 = vst [vmem:[%s1248_s15 + $0x50] sm:$0xff] %v628_v33  ;;  %v684_v47 = vmul.f32 %v628_v33, %v628_v33  ;;  %v755_v23 = vld [vmem:[%s1248_s15 + $0x8] sm:$0xff] (%p1173_p6)  ;;  %v759_v25 = vld [vmem:[%s1248_s15 + $0x18] sm:$0xff] (%p1173_p6) }
 0x1a0   : > { %647 = vst [vmem:[%s1248_s15 + $0x48] sm:$0xff] %v541_v34  ;;  %v664_v43 = vadd.f32 %v541_v34, %v539_v28  ;;  %v683_v44 = vmul.f32 %v541_v34, %v541_v34  ;;  %v544_v45 = vpop.f32.mrb[6].mxu0  ;;  %v661_v46 = vadd.f32 %v660_v36, %v624_v22  ;;  %649 = vst [vmem:[%s1248_s15 + $0x58] sm:$0xff] %v630_v40  ;;  %v633_v49 = vpop.f32.mrb[6].mxu1  ;;  %v753_v22 = vld [vmem:[%s1248_s15] sm:$0xff] (%p1173_p6) }
 0x1a1   : > { %v545_v48 = vadd.f32 %v544_v45, %v445_v42  ;;  %693 = vadd.xlane.f32.xlu1 %v692_v41  ;;  %v546_v50 = vpop.f32.mrb[7].mxu0  ;;  %v696_v52 = vadd.f32 %v695_v37, %v680_v38  ;;  %v634_v53 = vadd.f32 %v633_v49, %v445_v42  ;;  %v635_v55 = vpop.f32.mrb[7].mxu1  ;;  %v685_v63 = vmul.f32 %v630_v40, %v630_v40 }
 0x1a2   : > { %v547_v54 = vadd.f32 %v546_v50, %v445_v42  ;;  %v700_v56 = vadd.f32 %v683_v44, %v682_v39  ;;  %v665_v57 = vadd.f32 %v664_v43, %v628_v33  ;;  %v636_v59 = vadd.f32 %v635_v55, %v445_v42  ;;  %v761_v26 = vld [vmem:[%s1248_s15 + $0x20] sm:$0xff] (%p1173_p6)  ;;  %v765_v28 = vld [vmem:[%s1248_s15 + $0x30] sm:$0xff] (%p1173_p6)  ;;  %754 = vst [vmem:[%s740_s21] sm:$0xff] (%p1173_p6), %v753_v22 }
 0x1a3   : > { %650 = vst [vmem:[%s1248_s15 + $0x60] sm:$0xff] %v545_v48  ;;  %v686_v58 = vmul.f32 %v545_v48, %v545_v48  ;;  %v697_v60 = vadd.f32 %v696_v52, %v681_v51  ;;  %652 = vst [vmem:[%s1248_s15 + $0x70] sm:$0xff] %v634_v53  ;;  %v688_v2 = vmul.f32 %v634_v53, %v634_v53  ;;  %v763_v27 = vld [vmem:[%s1248_s15 + $0x28] sm:$0xff] (%p1173_p6)  ;;  %v767_v29 = vld [vmem:[%s1248_s15 + $0x38] sm:$0xff] (%p1173_p6) }
 0x1a4   : > { %651 = vst [vmem:[%s1248_s15 + $0x68] sm:$0xff] %v547_v54  ;;  %v669_v61 = vadd.f32 %v547_v54, %v545_v48  ;;  %v687_v62 = vmul.f32 %v547_v54, %v547_v54  ;;  %v701_v0 = vadd.f32 %v700_v56, %v684_v47  ;;  %653 = vst [vmem:[%s1248_s15 + $0x78] sm:$0xff] %v636_v59 }
 0x1a5   : > { %662 = vadd.xlane.f32.xlu1 %v661_v46  ;;  %698 = vadd.xlane.f32.xlu0 %v697_v60  ;;  %v666_v1 = vadd.f32 %v665_v57, %v630_v40  ;;  %v689_v7 = vmul.f32 %v636_v59, %v636_v59  ;;  %756 = vst [vmem:[%s740_s21 + $0x8] sm:$0xff] (%p1173_p6), %v755_v23  ;;  %758 = vst [vmem:[%s740_s21 + $0x10] sm:$0xff] (%p1173_p6), %v757_v24 }
 0x1a6   : > { %v702_v3 = vadd.f32 %v701_v0, %v685_v63  ;;  %v670_v4 = vadd.f32 %v669_v61, %v634_v53  ;;  %v705_v5 = vadd.f32 %v687_v62, %v686_v58  ;;  %v769_v30 = vld [vmem:[%s1248_s15 + $0x40] sm:$0xff] (%p1173_p6)  ;;  %v773_v32 = vld [vmem:[%s1248_s15 + $0x50] sm:$0xff] (%p1173_p6)  ;;  %760 = vst [vmem:[%s740_s21 + $0x18] sm:$0xff] (%p1173_p6), %v759_v25  ;;  %762 = vst [vmem:[%s740_s21 + $0x40] sm:$0xff] (%p1173_p6), %v761_v26 }
 0x1a7   : > { %v771_v31 = vld [vmem:[%s1248_s15 + $0x48] sm:$0xff] (%p1173_p6)  ;;  %v775_v33 = vld [vmem:[%s1248_s15 + $0x58] sm:$0xff] (%p1173_p6)  ;;  %764 = vst [vmem:[%s740_s21 + $0x48] sm:$0xff] (%p1173_p6), %v763_v27  ;;  %766 = vst [vmem:[%s740_s21 + $0x50] sm:$0xff] (%p1173_p6), %v765_v28 }
 0x1a8   : > { %v671_v6 = vadd.f32 %v670_v4, %v636_v59  ;;  %v706_v8 = vadd.f32 %v705_v5, %v688_v2  ;;  %768 = vst [vmem:[%s740_s21 + $0x58] sm:$0xff] (%p1173_p6), %v767_v29  ;;  %770 = vst [vmem:[%s740_s21 + $0x80] sm:$0xff] (%p1173_p6), %v769_v30 }
 0x1a9   : > { %703 = vadd.xlane.f32.xlu1 %v702_v3  ;;  %667 = vadd.xlane.f32.xlu0 %v666_v1  ;;  %772 = vst [vmem:[%s740_s21 + $0x88] sm:$0xff] (%p1173_p6), %v771_v31  ;;  %774 = vst [vmem:[%s740_s21 + $0x90] sm:$0xff] (%p1173_p6), %v773_v32 }
 0x1aa   : > { %v707_v9 = vadd.f32 %v706_v8, %v689_v7  ;;  %776 = vst [vmem:[%s740_s21 + $0x98] sm:$0xff] (%p1173_p6), %v775_v33  ;;  %v777_v34 = vld [vmem:[%s1248_s15 + $0x60] sm:$0xff] (%p1173_p6)  ;;  %v781_v36 = vld [vmem:[%s1248_s15 + $0x70] sm:$0xff] (%p1173_p6) }
 0x1ab   : > { %v779_v35 = vld [vmem:[%s1248_s15 + $0x68] sm:$0xff] (%p1173_p6)  ;;  %778 = vst [vmem:[%s740_s21 + $0xc0] sm:$0xff] (%p1173_p6), %v777_v34  ;;  %782 = vst [vmem:[%s740_s21 + $0xd0] sm:$0xff] (%p1173_p6), %v781_v36  ;;  %v783_v37 = vld [vmem:[%s1248_s15 + $0x78] sm:$0xff] (%p1173_p6) }
 0x1ac   : > { %780 = vst [vmem:[%s740_s21 + $0xc8] sm:$0xff] (%p1173_p6), %v779_v35  ;;  %784 = vst [vmem:[%s740_s21 + $0xd8] sm:$0xff] (%p1173_p6), %v783_v37 }
 0x1ad   : > { %672 = vadd.xlane.f32.xlu0 %v671_v6 }
 0x1b1   : > { %708 = vadd.xlane.f32.xlu0 %v707_v9 }
 0x22b   : > { %v658_v10 = vpop.xlane.xlu0 %657 }
 0x22e   : > { %v694_v11 = vpop.xlane.xlu1 %693 }
 0x22f   : > { %v711_v12 = vsel %vm710_vm1, %v658_v10, %v694_v11 }
 0x230   : > { %716 = vst.msk [vmem:[%s362_s30] sm:$0xff] %vm715_vm2, %v711_v12 }
 0x232   : > { %v663_v13 = vpop.xlane.xlu1 %662  ;;  %v699_v14 = vpop.xlane.xlu0 %698 }
 0x233   : > { %v712_v15 = vsel %vm710_vm1, %v663_v13, %v699_v14 }
 0x234   : > { %717 = vst.msk [vmem:[%s362_s30 + $0x8] sm:$0xff] %vm715_vm2, %v712_v15 }
 0x236   : > { %v704_v16 = vpop.xlane.xlu1 %703  ;;  %v668_v17 = vpop.xlane.xlu0 %667 }
 0x237   : > { %v713_v18 = vsel %vm710_vm1, %v668_v17, %v704_v16 }
 0x238   : > { %718 = vst.msk [vmem:[%s362_s30 + $0x10] sm:$0xff] %vm715_vm2, %v713_v18 }
 0x23a   : > { %v673_v19 = vpop.xlane.xlu0 %672  ;;  %735 = sbr.rel (!%p1173_p6) target bundleno = 577 (0x241), region = 67 }
 0x23e   : > { %v709_v20 = vpop.xlane.xlu0 %708 }
 0x23f   : > { %v714_v21 = vsel %vm710_vm1, %v673_v19, %v709_v20 }
 0x240   : > { %719 = vst.msk [vmem:[%s362_s30 + $0x18] sm:$0xff] %vm715_vm2, %v714_v21 }
 0x241 PF: > { %s17_s27 = sadd.s32 1, %s1086_s27   ;;  %s1332_s21 = smov %s1066_s22 }
 0x242   : > { %p14_p0 = scmp.ge.s32.totalorder %s17_s27, 6   ;;  %s1333_s22 = smov %s1181_s12 }
 0x243   : > { %s1334_s23 = smov %s1078_s25  ;;  %s1335_s24 = smov %s1082_s26 }
 0x244   : > { %s1336_s25 = smov %s1339_s28  ;;  %s1337_s26 = smov %s1343_s29 }
 0x245   :  { %16 = sbr.rel (!%p14_p0) target bundleno = 4 (0x4), region = 139 }

// kernel: cresnet_block.5
= control target key start
LH: loop header
LB: loop body
LE: loop exit
PB: predicated region body
PF: predicated region fallthrough
CT: control target
= control target key end

     0   :  { %s1409_s0 = inlined_call_operand.vmem [shape: f32[2,32,1024], index: 0, kind: input, shape index: {}]   ;;  %s1410_s1 = inlined_call_operand.vmem [shape: f32[2,16,1024], index: 1, kind: input, shape index: {}]   ;;  %s1411_s2 = inlined_call_operand.vmem [shape: f32[2,32,1], index: 2, kind: input, shape index: {}]   ;;  %s1412_s3 = inlined_call_operand.vmem [shape: f32[2,32,1], index: 3, kind: input, shape index: {}]   ;;  %s1413_s4 = inlined_call_operand.vmem [shape: f32[24,48], index: 4, kind: input, shape index: {}]   ;;  %s1414_s5 = inlined_call_operand.vmem [shape: f32[24,1], index: 5, kind: input, shape index: {}]   ;;  %s1415_s6 = inlined_call_operand.hbm [shape: f32[2,24,1024], index: 6, kind: output, shape index: {}]  }
   0x1   :  { %1416 = sst [smem:[#allocation7_spill]] %s1409_s0 }
   0x2   :  { %11 = vsyncpa [#allocation5], 0 }
   0x3   :  { %13 = vsyncpa [#allocation5 + $0x1], 0  ;;  %s1166_s21 = smov 0   ;;  %s1168_s22 = smov 0  }
   0x4   :  { %s1170_s23 = smov 0   ;;  %s1172_s24 = smov 0  }
   0x5   :  { %s1174_s25 = smov 0   ;;  %s1176_s26 = smov 0  }
   0x6   :  { %s1178_s27 = smov 0   ;;  %s1180_s28 = smov 0  }
   0x7 LB: > { %s894_s29 = sadd.s32 4294967295, %s1123_s28   ;;  %s895_s30 = sadd.s32 4294967294, %s1123_s28   ;;  %s1123_s28 = sphi %s1180_s28, %s19_s28   ;;  %s1119_s27 = sphi %s1178_s27, %s1427_s27   ;;  %s1115_s26 = sphi %s1176_s26, %s1426_s26   ;;  %s1111_s25 = sphi %s1174_s25, %s1425_s25   ;;  %s1107_s24 = sphi %s1172_s24, %s1424_s24   ;;  %s1103_s23 = sphi %s1170_s23, %s1423_s23   ;;  %s1099_s22 = sphi %s1168_s22, %s1422_s22   ;;  %s1095_s21 = sphi %s1166_s21, %s1421_s21  }
   0x8   : > { %s28_s7 = sadd.s32 1, %s1115_s26  ;;  %s31_s8 = sadd.s32 1, %s1119_s27 }
   0x9   : > { %p29_p0 = scmp.ge.s32.totalorder %s28_s7, 2  ;;  %p47_p1 = scmp.ne.s32.totalorder %s1103_s23, %s1099_s22 }
   0xa   : > { %p48_p2 = scmp.eq.s32.totalorder %s1123_s28, 0  ;;  %p201_p5 = scmp.eq.s32.totalorder %s894_s29, 3 }
   0xb   : > { %s1429_s7 = smov (%p29_p0, %s28_s7), 0  ;;  %s1431_s8 = smov (!%p29_p0, %s31_s8), %s1119_s27 }
   0xc   : > { %s36_s9 = ssub.s32 %s1115_s26, %s1429_s7  ;;  %p1218_p3 = por %p48_p2, %p47_p1 }
   0xd   : > { %p33_p4 = scmp.ge.s32.totalorder %s1431_s8, 2  ;;  %p206_p6 = scmp.ne.s32.totalorder %s1099_s22, %s1095_s21 }
   0xe   : > { %p207_p7 = scmp.eq.s32.totalorder %s895_s30, 3  ;;  %p1226_p8 = por %p201_p5, %p47_p1 }
   0xf   : > { %s1433_s8 = smov (%p33_p4, %s1431_s8), 0  ;;  %s40_s15 = sadd.s32 1, %s1103_s23 }
  0x10   : > { %p1230_p9 = por %p207_p7, %p206_p6  ;;  %s35_s13 = ssub.s32 %s1119_s27, %s1433_s8 }
  0x11   : > { %s37_s14 = sor.u32 %s36_s9, %s35_s13  ;;  %p897_p11 = scmp.ge.s32.totalorder %s1123_s28, 4 }
  0x12   : > { %p38_p10 = scmp.eq.s32.totalorder %s37_s14, 0 }
  0x13   : > { %229 = sbr.rel (%p897_p11) target bundleno = 55 (0x37), region = 24 }
  0x14   : > { %s1238_s16 = scalar_select %p38_p10, %s1103_s23, %s40_s15  }
  0x1a   : > { %232 = sbr.rel (!%p1218_p3) target bundleno = 44 (0x2c), region = 28  ;;  %s234_s17 = sand.u32 (%p1218_p3), 1, %s1103_s23  }
  0x1b   : > { %s899_s18 = sshll.u32 (%p1218_p3), %s1115_s26, 2  ;;  %s898_s19 = sshll.u32 (%p1218_p3), %s234_s17, 7 }
  0x1c   : > { %s900_s20 = sshll.u32 (%p1218_p3), %s1119_s27, 5  ;;  %s1420_s0 = sld [smem:[#allocation7_spill]] (%p1218_p3) }
  0x1d   : > { %s239_s29 = sadd.s32 (%p1218_p3), %s900_s20, %s899_s18  ;;  %s236_s15 = scalar_lea.vmem (%p1218_p3), [#allocation2], %s898_s19 }
  0x1e   : > { %s901_s30 = sshll.u32 (%p1218_p3), %s239_s29, 3 }
  0x22   : > { %s1249_s14 = scalar_lea.vmem %s1420_s0, %s901_s30 }
  0x23   : > { %v254_v0 = vld [vmem:[%s1249_s14] sm:$0xff]  ;;  %v256_v1 = vld [vmem:[%s1249_s14 + $0x8] sm:$0xff]  ;;  %v258_v2 = vld [vmem:[%s1249_s14 + $0x10] sm:$0xff] }
  0x24   : > { %255 = vst [vmem:[%s236_s15] sm:$0xff] %v254_v0  ;;  %257 = vst [vmem:[%s236_s15 + $0x8] sm:$0xff] %v256_v1  ;;  %v260_v3 = vld [vmem:[%s1249_s14 + $0x18] sm:$0xff]  ;;  %v262_v4 = vld [vmem:[%s1249_s14 + $0x40] sm:$0xff] }
  0x25   : > { %259 = vst [vmem:[%s236_s15 + $0x10] sm:$0xff] %v258_v2  ;;  %v264_v5 = vld [vmem:[%s1249_s14 + $0x48] sm:$0xff]  ;;  %261 = vst [vmem:[%s236_s15 + $0x18] sm:$0xff] %v260_v3  ;;  %v266_v6 = vld [vmem:[%s1249_s14 + $0x50] sm:$0xff] }
  0x26   : > { %263 = vst [vmem:[%s236_s15 + $0x20] sm:$0xff] %v262_v4  ;;  %265 = vst [vmem:[%s236_s15 + $0x28] sm:$0xff] %v264_v5  ;;  %v268_v7 = vld [vmem:[%s1249_s14 + $0x58] sm:$0xff]  ;;  %v270_v8 = vld [vmem:[%s1249_s14 + $0x80] sm:$0xff] }
  0x27   : > { %267 = vst [vmem:[%s236_s15 + $0x30] sm:$0xff] %v266_v6  ;;  %269 = vst [vmem:[%s236_s15 + $0x38] sm:$0xff] %v268_v7  ;;  %v272_v9 = vld [vmem:[%s1249_s14 + $0x88] sm:$0xff]  ;;  %v274_v10 = vld [vmem:[%s1249_s14 + $0x90] sm:$0xff] }
  0x28   : > { %271 = vst [vmem:[%s236_s15 + $0x40] sm:$0xff] %v270_v8  ;;  %v276_v11 = vld [vmem:[%s1249_s14 + $0x98] sm:$0xff]  ;;  %273 = vst [vmem:[%s236_s15 + $0x48] sm:$0xff] %v272_v9  ;;  %v278_v12 = vld [vmem:[%s1249_s14 + $0xc0] sm:$0xff] }
  0x29   : > { %275 = vst [vmem:[%s236_s15 + $0x50] sm:$0xff] %v274_v10  ;;  %277 = vst [vmem:[%s236_s15 + $0x58] sm:$0xff] %v276_v11  ;;  %v280_v13 = vld [vmem:[%s1249_s14 + $0xc8] sm:$0xff]  ;;  %v282_v14 = vld [vmem:[%s1249_s14 + $0xd0] sm:$0xff] }
  0x2a   : > { %279 = vst [vmem:[%s236_s15 + $0x60] sm:$0xff] %v278_v12  ;;  %281 = vst [vmem:[%s236_s15 + $0x68] sm:$0xff] %v280_v13  ;;  %v284_v15 = vld [vmem:[%s1249_s14 + $0xd8] sm:$0xff] }
  0x2b   : > { %283 = vst [vmem:[%s236_s15 + $0x70] sm:$0xff] %v282_v14  ;;  %285 = vst [vmem:[%s236_s15 + $0x78] sm:$0xff] %v284_v15 }
  0x2c PF: > { %291 = sbr.rel (!%p1218_p3) target bundleno = 55 (0x37), region = 51  ;;  %s293_s17 = sand.u32 (%p1218_p3), 1, %s1103_s23  }
  0x2d   : > { %s903_s18 = sshll.u32 (%p1218_p3), %s1115_s26, 2  ;;  %s902_s19 = sshll.u32 (%p1218_p3), %s293_s17, 6 }
  0x2e   : > { %s904_s20 = sshll.u32 (%p1218_p3), %s1119_s27, 4  ;;  %s295_s14 = scalar_lea.vmem (%p1218_p3), [#allocation3], %s902_s19 }
  0x2f   : > { %s298_s29 = sadd.s32 (%p1218_p3), %s904_s20, %s903_s18 }
  0x30   : > { %s905_s30 = sshll.u32 (%p1218_p3), %s298_s29, 3 }
  0x31   : > { %s300_s0 = scalar_lea.vmem (%p1218_p3), %s1410_s1, %s905_s30 }
  0x32   : > { %v313_v16 = vld [vmem:[%s300_s0] sm:$0xff] (%p1218_p3)  ;;  %v315_v17 = vld [vmem:[%s300_s0 + $0x8] sm:$0xff] (%p1218_p3)  ;;  %v317_v18 = vld [vmem:[%s300_s0 + $0x10] sm:$0xff] (%p1218_p3) }
  0x33   : > { %314 = vst [vmem:[%s295_s14] sm:$0xff] %v313_v16  ;;  %316 = vst [vmem:[%s295_s14 + $0x8] sm:$0xff] %v315_v17  ;;  %v319_v19 = vld [vmem:[%s300_s0 + $0x18] sm:$0xff]  ;;  %v321_v20 = vld [vmem:[%s300_s0 + $0x40] sm:$0xff] }
  0x34   : > { %318 = vst [vmem:[%s295_s14 + $0x10] sm:$0xff] %v317_v18  ;;  %v323_v21 = vld [vmem:[%s300_s0 + $0x48] sm:$0xff]  ;;  %320 = vst [vmem:[%s295_s14 + $0x18] sm:$0xff] %v319_v19  ;;  %v325_v22 = vld [vmem:[%s300_s0 + $0x50] sm:$0xff] }
  0x35   : > { %322 = vst [vmem:[%s295_s14 + $0x20] sm:$0xff] %v321_v20  ;;  %324 = vst [vmem:[%s295_s14 + $0x28] sm:$0xff] %v323_v21  ;;  %v327_v23 = vld [vmem:[%s300_s0 + $0x58] sm:$0xff] }
  0x36   : > { %326 = vst [vmem:[%s295_s14 + $0x30] sm:$0xff] %v325_v22  ;;  %328 = vst [vmem:[%s295_s14 + $0x38] sm:$0xff] %v327_v23 }
  0x37 PF: > { %p906_p12 = scmp.ge.s32.totalorder %s1123_s28, 1  ;;  %p349_p13 = scmp.lt.s32.totalorder %s1123_s28, 5 }
  0x39   : > { %p350_p0 = pnand %p906_p12, %p349_p13 }
  0x3a   : > { %p408_p1 = scmp.lt.s32.totalorder (!%p350_p0), %s1111_s25, 1  ;;  %v1125_v24 = vmov (!%p350_p0), 0   ;;  %v543_v33 = vld [vmem:[%s1414_s5 + $0x8] sm:$0xff] (!%p350_p0)  ;;  %v542_v34 = vld [vmem:[%s1414_s5] sm:$0xff] (!%p350_p0)  ;;  %v544_v35 = vld [vmem:[%s1414_s5 + $0x10] sm:$0xff] (!%p350_p0)  ;;  %v1126_v36 = vmov (!%p350_p0), 0.0  }
  0x3b   : > { %353 = sbr.rel (%p350_p0) target bundleno = 465 (0x1d1), region = 82  ;;  %1028 = vset.pattern.permute.xlu1 (!%p350_p0), %v1125_v24  ;;  %1027 = vset.pattern.permute.xlu0 (!%p350_p0), %v1125_v24  ;;  %s1297_s17 = sand.u32 (!%p350_p0), 1, %s1099_s22   ;;  %vm560_vm0 = vcmask (!%p350_p0), 392192  }
  0x3c   : > { %634 = vmatprep.mubr.f32.mxu0 (!%p350_p0), %v1126_v36  ;;  %717 = vmatprep.mubr.f32.mxu1 (!%p350_p0), %v1126_v36  ;;  %s907_s0 = sshll.u32 (!%p350_p0), %s1297_s17, 7  ;;  %s908_s19 = sshll.u32 (!%p350_p0), %s1297_s17, 6 }
  0x3d   : > { %s365_s20 = scalar_lea.vmem (!%p350_p0), [#allocation3], %s908_s19  ;;  %s749_s13 = scalar_lea.sflag (!%p350_p0), [#allocation5], %s1297_s17 }
  0x42   : > { %s409_s10 = scalar_select %p408_p1, %s1111_s25, 1 }
  0x44   : > { %s923_s15 = sshll.u32 %s409_s10, 5  ;;  %s1127_s10 = smov [#allocation4]  }
  0x45   : > { %s417_s18 = scalar_lea.vmem %s1412_s3, %s923_s15  ;;  %s412_s29 = scalar_lea.vmem %s1411_s2, %s923_s15 }
  0x46   : > { %v447_v25 = vld [vmem:[%s417_s18] sm:$0xff]  ;;  %v448_v27 = vld [vmem:[%s417_s18 + $0x8] sm:$0xff]  ;;  %v446_v29 = vld [vmem:[%s412_s29 + $0x18] sm:$0xff]  ;;  %s949_s15 = smul.u32 96, %s1297_s17 }
  0x47   : > { %v443_v26 = vld [vmem:[%s412_s29] sm:$0xff]  ;;  %489 = vperm.xlu1 %1028, %v447_v25   ;;  %v444_v28 = vld [vmem:[%s412_s29 + $0x8] sm:$0xff]  ;;  %v445_v30 = vld [vmem:[%s412_s29 + $0x10] sm:$0xff] }
  0x48   : > { %453 = vperm.xlu0 %1027, %v443_v26   ;;  %v450_v31 = vld [vmem:[%s417_s18 + $0x18] sm:$0xff]  ;;  %v449_v32 = vld [vmem:[%s417_s18 + $0x10] sm:$0xff]  ;;  %s1300_s18 = scalar_lea.vmem [#allocation2], %s907_s0  ;;  %s950_s0 = smul.u32 24, %s1111_s25 }
  0x49   : > { %v419_v37 = vld [vmem:[%s1300_s18] sm:$0xff]  ;;  %v421_v38 = vld [vmem:[%s1300_s18 + $0x10] sm:$0xff]  ;;  %v420_v39 = vld [vmem:[%s1300_s18 + $0x8] sm:$0xff]  ;;  %s1335_s19 = scalar_lea.vmem [#allocation4], %s949_s15  ;;  %s1033_s15 = sshll.u32 %s1127_s10, 4  ;;  %s1034_s15 = int_to_ptr.vmem [resolvable:$false] %s1033_s15 }
  0x4a   : > { %v422_v40 = vld [vmem:[%s1300_s18 + $0x18] sm:$0xff]  ;;  %v423_v47 = vld [vmem:[%s1300_s18 + $0x20] sm:$0xff]  ;;  %v425_v48 = vld [vmem:[%s1300_s18 + $0x30] sm:$0xff] }
  0x4b   : > { %494 = vperm.xlu1 %1028, %v448_v27   ;;  %v424_v49 = vld [vmem:[%s1300_s18 + $0x28] sm:$0xff]  ;;  %v426_v50 = vld [vmem:[%s1300_s18 + $0x38] sm:$0xff]  ;;  %v431_v60 = vld [vmem:[%s1300_s18 + $0x60] sm:$0xff] }
  0x4c   : > { %458 = vperm.xlu0 %1027, %v444_v28   ;;  %v432_v62 = vld [vmem:[%s1300_s18 + $0x68] sm:$0xff]  ;;  %v433_v63 = vld [vmem:[%s1300_s18 + $0x70] sm:$0xff]  ;;  %v434_v0 = vld [vmem:[%s1300_s18 + $0x78] sm:$0xff] }
  0x4d   : > { %v427_v6 = vld [vmem:[%s1300_s18 + $0x40] sm:$0xff]  ;;  %v428_v7 = vld [vmem:[%s1300_s18 + $0x48] sm:$0xff]  ;;  %v429_v8 = vld [vmem:[%s1300_s18 + $0x50] sm:$0xff] }
  0x4e   : > { %v430_v10 = vld [vmem:[%s1300_s18 + $0x58] sm:$0xff]  ;;  %s919_s18 = sshll.u32 %s1107_s24, 2  ;;  %s764_s24 = sshll.u32 %s1335_s19, 4  ;;  %s1346_s24 = int_to_ptr.vmem [resolvable:$true] %s764_s24 }
  0x4f   : > { %468 = vperm.xlu1 %1028, %v446_v29   ;;  %s761_s25 = sadd.s32 %s950_s0, %s919_s18  ;;  %s1029_s14 = scalar_lea.vmem %s1346_s24, 1536 }
  0x50   : > { %463 = vperm.xlu0 %1027, %v445_v30   ;;  %p1030_p2 = scmp.ne.s32.totalorder %s1346_s24, %s1029_s14  ;;  %s1035_s0 = scalar_lea.vmem %s1034_s15, 3072 }
  0x51   : > { %p1036_p5 = scmp.lt.s32.totalorder %s1346_s24, %s1034_s15  ;;  %p1037_p6 = scmp.lt.s32.totalorder %s1035_s0, %s1029_s14 }
  0x52   : > { %p1031_p3 = pnand %p1030_p2, %p1226_p8 }
  0x53   : > { %504 = vperm.xlu1 %1028, %v450_v31   ;;  %p1038_p7 = por %p1037_p6, %p1036_p5 }
  0x54   : > { %499 = vperm.xlu0 %1027, %v449_v32   ;;  %p1032_p4 = pneg %p1031_p3 }
  0x56   : > { %p1039_p10 = pnand %p1038_p7, %p1032_p4 }
  0x57   : > { %552 = vperm.xlu1 %1028, %v543_v33  }
  0x58   : > { %547 = vperm.xlu0 %1027, %v542_v34  }
  0x5c   : > { %557 = vperm.xlu0 %1027, %v544_v35  }
  0xc6   : > { %v490_v41 = vpop.permute.xlu1 %489 }
  0xc7   : > { %v454_v42 = vpop.permute.xlu0 %453 }
  0xc8   : > { %v471_v43 = vmul.f32 %v454_v42, %v419_v37  ;;  %v473_v44 = vmul.f32 %v454_v42, %v421_v38  ;;  %v472_v45 = vmul.f32 %v454_v42, %v420_v39  ;;  %v474_v46 = vmul.f32 %v454_v42, %v422_v40  ;;  %v436_v42 = vld [vmem:[%s365_s20 + $0x8] sm:$0xff] }
  0xca   : > { %v495_v51 = vpop.permute.xlu1 %494  ;;  %v508_v53 = vadd.f32 %v490_v41, %v472_v45  ;;  %v510_v54 = vadd.f32 %v490_v41, %v474_v46  ;;  %v507_v55 = vadd.f32 %v490_v41, %v471_v43  ;;  %v509_v59 = vadd.f32 %v490_v41, %v473_v44  ;;  %v440_v43 = vld [vmem:[%s365_s20 + $0x28] sm:$0xff] }
  0xcb   : > { %v459_v52 = vpop.permute.xlu0 %458 }
  0xcc   : > { %v475_v56 = vmul.f32 %v459_v52, %v423_v47  ;;  %v477_v57 = vmul.f32 %v459_v52, %v425_v48  ;;  %v476_v58 = vmul.f32 %v459_v52, %v424_v49  ;;  %v478_v61 = vmul.f32 %v459_v52, %v426_v50  ;;  %v438_v48 = vld [vmem:[%s365_s20 + $0x18] sm:$0xff] }
  0xcd   : > { %v524_v11 = vmax.f32 %v508_v53, 0.0  ;;  %v526_v12 = vmax.f32 %v510_v54, 0.0  ;;  %v523_v13 = vmax.f32 %v507_v55, 0.0  ;;  %v525_v14 = vmax.f32 %v509_v59, 0.0  ;;  %v442_v49 = vld [vmem:[%s365_s20 + $0x38] sm:$0xff] }
  0xce   : > { %v512_v1 = vadd.f32 %v495_v51, %v476_v58  ;;  %v511_v2 = vadd.f32 %v495_v51, %v475_v56  ;;  %v513_v3 = vadd.f32 %v495_v51, %v477_v57  ;;  %v469_v4 = vpop.permute.xlu1 %468  ;;  %v514_v9 = vadd.f32 %v495_v51, %v478_v61  ;;  %v435_v56 = vld [vmem:[%s365_s20] sm:$0xff] }
  0xcf   : > { %v464_v5 = vpop.permute.xlu0 %463  ;;  %v483_v15 = vmul.f32 %v469_v4, %v431_v60  ;;  %v484_v16 = vmul.f32 %v469_v4, %v432_v62  ;;  %v485_v17 = vmul.f32 %v469_v4, %v433_v63  ;;  %v486_v18 = vmul.f32 %v469_v4, %v434_v0  ;;  %v439_v61 = vld [vmem:[%s365_s20 + $0x20] sm:$0xff]  ;;  %v437_v62 = vld [vmem:[%s365_s20 + $0x10] sm:$0xff] }
  0xd0   : > { %v528_v19 = vmax.f32 %v512_v1, 0.0  ;;  %v530_v20 = vmax.f32 %v514_v9, 0.0  ;;  %v527_v21 = vmax.f32 %v511_v2, 0.0  ;;  %v529_v22 = vmax.f32 %v513_v3, 0.0  ;;  %v441_v63 = vld [vmem:[%s365_s20 + $0x30] sm:$0xff]  ;;  %v539_v2 = vld [vmem:[%s1413_s4] sm:$0xff] }
  0xd1   : > { %v479_v23 = vmul.f32 %v464_v5, %v427_v6  ;;  %v480_v24 = vmul.f32 %v464_v5, %v428_v7  ;;  %v481_v25 = vmul.f32 %v464_v5, %v429_v8  ;;  %v482_v26 = vmul.f32 %v464_v5, %v430_v10  ;;  %v540_v3 = vld [vmem:[%s1413_s4 + $0x8] sm:$0xff]  ;;  %v541_v4 = vld [vmem:[%s1413_s4 + $0x10] sm:$0xff]  ;;  %s920_s20 = sshll.u32 %s761_s25, 7 }
  0xd2   : > { %v505_v27 = vpop.permute.xlu1 %504  ;;  %v925_v38 = vpack.c.bf16 %v528_v19, %v524_v11  ;;  %v937_v39 = vpack.c.bf16 %v530_v20, %v526_v12  ;;  %v927_v40 = vpack.c.bf16 %v527_v21, %v523_v13  ;;  %v939_v41 = vpack.c.bf16 %v529_v22, %v525_v14  ;;  %s1351_s9 = scalar_lea.hbm %s1415_s6, %s920_s20 }
  0xd3   : > { %v500_v28 = vpop.permute.xlu0 %499  ;;  %v519_v29 = vadd.f32 %v505_v27, %v483_v15  ;;  %v520_v30 = vadd.f32 %v505_v27, %v484_v16  ;;  %v521_v31 = vadd.f32 %v505_v27, %v485_v17  ;;  %v522_v32 = vadd.f32 %v505_v27, %v486_v18 }
  0xd4   : > { %v515_v33 = vadd.f32 %v500_v28, %v479_v23  ;;  %v516_v34 = vadd.f32 %v500_v28, %v480_v24  ;;  %v517_v35 = vadd.f32 %v500_v28, %v481_v25  ;;  %v518_v37 = vadd.f32 %v500_v28, %v482_v26  ;;  %926 = vmatprep.subr.bf16.mxu0 %v925_v38 }
  0xd5   : > { %v536_v45 = vmax.f32 %v520_v30, 0.0  ;;  %v538_v47 = vmax.f32 %v522_v32, 0.0  ;;  %938 = vmatprep.subr.bf16.mxu1 %v937_v39  ;;  %v535_v51 = vmax.f32 %v519_v29, 0.0  ;;  %v537_v53 = vmax.f32 %v521_v31, 0.0  ;;  %928 = vmatpush1.bf16.msra.mxu0 %v927_v40 }
  0xd6   : > { %v532_v44 = vmax.f32 %v516_v34, 0.0  ;;  %v534_v46 = vmax.f32 %v518_v37, 0.0  ;;  %v531_v50 = vmax.f32 %v515_v33, 0.0  ;;  %v533_v52 = vmax.f32 %v517_v35, 0.0  ;;  %940 = vmatpush1.bf16.msra.mxu1 %v939_v41  ;;  %v553_v14 = vpop.permute.xlu1 %552 }
  0xd7   : > { %v933_v59 = vpack.c.bf16 %v440_v43, %v436_v42  ;;  %v945_v60 = vpack.c.bf16 %v442_v49, %v438_v48  ;;  %v935_v0 = vpack.c.bf16 %v439_v61, %v435_v56  ;;  %v947_v1 = vpack.c.bf16 %v441_v63, %v437_v62  ;;  %v548_v5 = vpop.permute.xlu0 %547 }
  0xd8   : > { %v929_v54 = vpack.c.bf16 %v536_v45, %v532_v44  ;;  %v941_v55 = vpack.c.bf16 %v538_v47, %v534_v46  ;;  %v931_v57 = vpack.c.bf16 %v535_v51, %v531_v50  ;;  %v943_v58 = vpack.c.bf16 %v537_v53, %v533_v52 }
  0xda   : > { %930 = vmatprep.subr.bf16.mxu0 %v929_v54  ;;  %942 = vmatprep.subr.bf16.mxu1 %v941_v55 }
  0xdb   : > { %932 = vmatpush1.bf16.msra.mxu0 %v931_v57  ;;  %944 = vmatpush1.bf16.msra.mxu1 %v943_v58  ;;  %v558_v22 = vpop.permute.xlu0 %557 }
  0xdc   : > { %934 = vmatprep.subr.bf16.mxu0 %v933_v59  ;;  %946 = vmatprep.subr.bf16.mxu1 %v945_v60 }
  0xdf   : > { %936 = vmatpush1.bf16.msra.mxu0 %v935_v0  ;;  %948 = vmatpush1.bf16.msra.mxu1 %v947_v1 }
  0xe2   : > { %913 = vmatmul.mubr.msk.f32.vlgmr.msra.gmra.mrb[0].mxu0 %vm560_vm0, %v539_v2  ;;  %916 = vmatmul.mubr.msk.f32.vlgmr.msra.gmra.mrb[0].mxu1 %vm560_vm0, %v539_v2 }
  0xe3   : > { %640 = vmatprep.mubr.f32.mxu0 %v1126_v36  ;;  %723 = vmatprep.mubr.f32.mxu1 %v1126_v36 }
  0xe6   : > { %914 = vmatmul.mubr.msk.f32.gmra.mrb[2].mxu0 %vm560_vm0, %v540_v3  ;;  %917 = vmatmul.mubr.msk.f32.gmra.mrb[2].mxu1 %vm560_vm0, %v540_v3 }
  0xe7   : > { %646 = vmatprep.mubr.f32.mxu0 %v1126_v36  ;;  %729 = vmatprep.mubr.f32.mxu1 %v1126_v36 }
  0xea   : > { %915 = vmatmul.mubr.msk.f32.gmra.mrb[4].mxu0 %vm560_vm0, %v541_v4  ;;  %918 = vmatmul.mubr.msk.f32.gmra.mrb[4].mxu1 %vm560_vm0, %v541_v4 }
 0x1b5   : > { %v636_v6 = vpop.f32.mrb[0].mxu0  ;;  %v719_v7 = vpop.f32.mrb[0].mxu1 }
 0x1b6   : > { %v637_v8 = vadd.f32 %v636_v6, %v548_v5  ;;  %v720_v9 = vadd.f32 %v719_v7, %v548_v5  ;;  %v638_v10 = vpop.f32.mrb[1].mxu0  ;;  %v721_v11 = vpop.f32.mrb[1].mxu1 }
 0x1b7   : > { %v639_v12 = vadd.f32 %v638_v10, %v548_v5  ;;  %v722_v13 = vadd.f32 %v721_v11, %v548_v5 }
 0x1b8   : > { %736 = vst [vmem:[%s1335_s19] sm:$0xff] %v637_v8  ;;  %738 = vst [vmem:[%s1335_s19 + $0x10] sm:$0xff] %v720_v9 }
 0x1b9   : > { %737 = vst [vmem:[%s1335_s19 + $0x8] sm:$0xff] %v639_v12  ;;  %739 = vst [vmem:[%s1335_s19 + $0x18] sm:$0xff] %v722_v13  ;;  %v642_v36 = vpop.f32.mrb[2].mxu0  ;;  %v725_v15 = vpop.f32.mrb[2].mxu1 }
 0x1ba   : > { %v643_v16 = vadd.f32 %v642_v36, %v553_v14  ;;  %v726_v17 = vadd.f32 %v725_v15, %v553_v14  ;;  %v644_v18 = vpop.f32.mrb[3].mxu0  ;;  %v727_v19 = vpop.f32.mrb[3].mxu1 }
 0x1bb   : > { %v645_v20 = vadd.f32 %v644_v18, %v553_v14  ;;  %v728_v21 = vadd.f32 %v727_v19, %v553_v14 }
 0x1bc   : > { %740 = vst [vmem:[%s1335_s19 + $0x20] sm:$0xff] %v643_v16  ;;  %742 = vst [vmem:[%s1335_s19 + $0x30] sm:$0xff] %v726_v17 }
 0x1bd   : > { %741 = vst [vmem:[%s1335_s19 + $0x28] sm:$0xff] %v645_v20  ;;  %743 = vst [vmem:[%s1335_s19 + $0x38] sm:$0xff] %v728_v21  ;;  %v648_v23 = vpop.f32.mrb[4].mxu0  ;;  %v731_v24 = vpop.f32.mrb[4].mxu1 }
 0x1be   : > { %v649_v25 = vadd.f32 %v648_v23, %v558_v22  ;;  %v732_v26 = vadd.f32 %v731_v24, %v558_v22  ;;  %v650_v27 = vpop.f32.mrb[5].mxu0  ;;  %v733_v28 = vpop.f32.mrb[5].mxu1 }
 0x1bf   : > { %v651_v29 = vadd.f32 %v650_v27, %v558_v22  ;;  %v734_v30 = vadd.f32 %v733_v28, %v558_v22 }
 0x1c0   : > { %744 = vst [vmem:[%s1335_s19 + $0x40] sm:$0xff] %v649_v25  ;;  %746 = vst [vmem:[%s1335_s19 + $0x50] sm:$0xff] %v732_v26 }
 0x1c1   : > { %745 = vst [vmem:[%s1335_s19 + $0x48] sm:$0xff] %v651_v29  ;;  %747 = vst [vmem:[%s1335_s19 + $0x58] sm:$0xff] %v734_v30 }
 0x1c2   : > { %1042 = shalt.err (!%p1039_p10)
}
 0x1c3   : > { %s1043_s18 = scalar_lea.hbm %s1351_s9, 1536  ;;  %s1047_s20 = scalar_lea.hbm %s1415_s6, 6144 }
 0x1c4   : > { %p1044_p11 = scmp.ne.s32.totalorder %s1351_s9, %s1043_s18  ;;  %p1048_p0 = scmp.lt.u32.totalorder %s1351_s9, %s1415_s6 }
 0x1c5   : > { %p1049_p1 = scmp.lt.u32.totalorder %s1047_s20, %s1043_s18  ;;  %p1051_p3 = scmp.lt.u32.totalorder %s1043_s18, %s1351_s9 }
 0x1c6   : > { %p1045_p12 = pnand %p1044_p11, %p1226_p8 }
 0x1c7   : > { %p1050_p2 = por %p1049_p1, %p1048_p0 }
 0x1c8   : > { %p1046_p13 = pneg %p1045_p12 }
 0x1c9   : > { %p1052_p4 = por %p1051_p3, %p1050_p2 }
 0x1cb   : > { %p1053_p5 = pnand %p1052_p4, %p1046_p13 }
 0x1cd   : > { %1056 = shalt.err (!%p1053_p5)
}
 0x1ce   : > { %s1128_s14 = smov 512   ;;  %s1129_s10 = smov 1024  }
 0x1cf   : > { %s1130_s15 = smov 32  }
 0x1d0   : > { %951 = dma.vmem_to_hbm [thread:$0]  (%p1226_p8), %s1346_s24, 1536, %s1351_s9, %s749_s13, %s1128_s14, %s1129_s10, %s1130_s15  }
 0x1d1 PF: > { %p957_p6 = scmp.ge.s32.totalorder %s1123_s28, 2  ;;  %s779_s0 = sand.u32 1, %s1095_s21  }
 0x1d2   : > { %s780_s18 = scalar_lea.sflag [#allocation5], %s779_s0 }
 0x1d3   : > { %p954_p7 = pnand %p957_p6, %p1230_p9 }
 0x1d5   : > { %1090 = dma.done.wait (!%p954_p7), %s780_s18, 1536  }
 0x1d6   : > { %1092 = vsyncadd (!%p954_p7), %s780_s18, 4294965760  ;;  %s19_s28 = sadd.s32 1, %s1123_s28   ;;  %s1421_s21 = smov %s1099_s22 }
 0x1d7   : > { %p16_p10 = scmp.ge.s32.totalorder %s19_s28, 6   ;;  %s1422_s22 = smov %s1103_s23 }
 0x1d8   : > { %s1423_s23 = smov %s1238_s16  ;;  %s1424_s24 = smov %s1115_s26 }
 0x1d9   : > { %s1425_s25 = smov %s1119_s27  ;;  %s1426_s26 = smov %s1429_s7 }
 0x1da   : > { %s1427_s27 = smov %s1433_s8  ;;  %18 = sbr.rel (!%p16_p10) target bundleno = 7 (0x7), region = 144 }
 0x1e1   :  { %785 = vsyncpa [#allocation5], 1 }
 0x1e2   :  { %787 = vsyncpa [#allocation5 + $0x1], 1 }

</bundles_post_ra>
